<compile_context>
chip_gen: v6e
topology: v6e:2x2x1
jax: 0.10.0
libtpu: 0.0.40
codegen_flags: <defaults>
</compile_context>

<pallas_src>
import functools

import jax
import jax.numpy as jnp
from jax.experimental import pallas as pl
from jax.experimental.pallas import tpu as pltpu

KSIZE = 7
PAD = 3


def cbam_kernel(x_ref, w1_ref, w2_ref, cm_ref, o_ref, *, elem_dtype):
    # x_ref block: (Nb, C, H*W) -- C on sublanes, H*W on lanes.
    x = x_ref[...]
    nb, c, hw = x.shape
    xe = x.astype(elem_dtype)            # elementwise working copy (bf16 on v6e/v7x)

    # ---------------- channel attention ----------------
    avg_c = jnp.mean(x, axis=2, dtype=jnp.float32)      # (Nb, C)   lane reduce
    max_c = jnp.max(x, axis=2).astype(jnp.float32)      # (Nb, C)
    pooled = jnp.concatenate([avg_c, max_c], axis=0)    # (2*Nb, C) sublane-aligned

    # Hidden dim is zero-padded to 128 lanes in the wrapper; padded channels
    # are exactly zero through the ReLU and contribute nothing to `mlp`.
    h = jnp.maximum(
        jnp.dot(pooled, w1_ref[...], preferred_element_type=jnp.float32), 0.0)
    mlp = jnp.dot(h, w2_ref[...], preferred_element_type=jnp.float32)   # (2*Nb, C)

    ca = jax.nn.sigmoid(mlp[:nb] + mlp[nb:])             # (Nb, C)
    x1 = xe * ca.astype(elem_dtype)[:, :, None]          # (Nb, C, H*W)

    # ---------------- spatial attention ----------------
    avg_s = jnp.mean(x1, axis=1, dtype=jnp.float32)      # (Nb, H*W) sublane reduce
    max_s = jnp.max(x1, axis=1).astype(jnp.float32)      # (Nb, H*W)
    sp = jnp.concatenate([avg_s, max_s], axis=1)         # (Nb, 2*H*W)

    # Zero-padded 7x7 conv expressed as one MXU matmul against the precomputed
    # bf16 conv matrix (weights-only precompute in the wrapper); f32 accumulate.
    logits = jnp.dot(sp.astype(cm_ref.dtype), cm_ref[...],
                     preferred_element_type=jnp.float32)  # (Nb, H*W)
    sa = jax.nn.sigmoid(logits)

    o_ref[...] = (x1 * sa.astype(elem_dtype)[:, None, :]).astype(o_ref.dtype)


def conv7x7_as_matrix(conv_w, H, W):
    """Build M of shape (2*H*W, H*W) such that, for a 2-channel map sp of shape
    (2, H, W):  (sp.reshape(1, -1) @ M).reshape(H, W)  equals
    Conv2d(2->1, kernel=7, padding=3, bias=False)(sp).  Weights-only precompute."""
    w = conv_w[0].astype(jnp.float32)                 # (2, 7, 7)
    iy = jnp.arange(H)
    ix = jnp.arange(W)
    dy = iy[:, None] - iy[None, :] + PAD              # (H, H): dy[in_row, out_row]
    dx = ix[:, None] - ix[None, :] + PAD              # (W, W)
    vy = (dy >= 0) & (dy < KSIZE)
    vx = (dx >= 0) & (dx < KSIZE)
    dyc = jnp.clip(dy, 0, KSIZE - 1)
    dxc = jnp.clip(dx, 0, KSIZE - 1)
    # m[c, iy, ix, y, x] = w[c, iy - y + 3, ix - x + 3]  (zero when out of range)
    m = w[:, dyc[:, None, :, None], dxc[None, :, None, :]]        # (2, H, W, H, W)
    mask = (vy[:, None, :, None] & vx[None, :, None, :]).astype(jnp.float32)
    m = m * mask[None]
    return m.reshape(2 * H * W, H * W)


def _device_kind():
    try:
        return jax.devices()[0].device_kind.lower()
    except Exception:
        return ""


def _is_v5e(kind):
    return ("v5 lite" in kind) or ("v5e" in kind) or ("v5litepod" in kind)


def _max_block_batch(kind):
    # v5e: 16 MiB default scoped VMEM and ~0.8 TB/s HBM -> Nb=32 is plenty.
    # v6e/v7x: bigger scoped VMEM + faster HBM -> push Nb to 64.
    if _is_v5e(kind):
        return 32
    if ("v6" in kind) or ("v7" in kind):
        return 64
    return 32


def _choose_block_batch(n_padded, max_nb):
    """Largest multiple-of-8 block dividing n_padded, capped at max_nb; prefer
    a block that leaves >= 2 grid steps so v7x can use both TensorCores."""
    cands = [nb for nb in range(8, max_nb + 1, 8) if n_padded % nb == 0]
    if not cands:
        return min(8, n_padded)
    multi = [nb for nb in cands if n_padded // nb >= 2]
    return max(multi) if multi else max(cands)


def cbam_forward(x_nchw, f1_w, f2_w, conv_w):
    """x_nchw: (N, C, H, W).  f1_w: (hidden, C, 1, 1), f2_w: (C, hidden, 1, 1),
    conv_w: (1, 2, 7, 7).  Returns NCHW output in x_nchw.dtype."""
    N, C, H, W = x_nchw.shape
    hidden = f1_w.shape[0]
    HW = H * W

    kind = _device_kind()
    n_pad = (-N) % 8
    Np = N + n_pad
    nb = _choose_block_batch(Np, _max_block_batch(kind))

    # bf16 elementwise path for bf16 inputs on bf16-VPU chips (v6e/v7x).
    if x_nchw.dtype == jnp.bfloat16 and not _is_v5e(kind):
        elem_dtype = jnp.bfloat16
    else:
        elem_dtype = jnp.float32

    x_flat = x_nchw.reshape(N, C, HW)                              # free view of NCHW
    if n_pad:
        x_flat = jnp.concatenate(
            [x_flat, jnp.zeros((n_pad, C, HW), x_flat.dtype)], axis=0)

    # Channel-MLP weights, hidden dim zero-padded to a full 128-lane width.
    HP = max(128, ((hidden + 127) // 128) * 128)
    w1 = jnp.transpose(f1_w[:, :, 0, 0]).astype(jnp.float32)       # (C, hidden)
    w2 = jnp.transpose(f2_w[:, :, 0, 0]).astype(jnp.float32)       # (hidden, C)
    w1p = jnp.zeros((C, HP), jnp.float32).at[:, :hidden].set(w1)   # (C, HP)
    w2p = jnp.zeros((HP, C), jnp.float32).at[:hidden, :].set(w2)   # (HP, C)

    # TODO(synk): for large feature maps the (2*H*W, H*W) conv matrix becomes
    # impractical; switch to a stripe-tiled roll-based 7x7 conv in that regime.
    conv_mat = conv7x7_as_matrix(conv_w, H, W).astype(jnp.bfloat16)  # (2*HW, HW)

    kernel = functools.partial(cbam_kernel, elem_dtype=elem_dtype)
    const_buf = pl.Buffered(1)   # constant operands: DMA once, no double buffer

    out_flat = pl.pallas_call(
        kernel,
        out_shape=jax.ShapeDtypeStruct((Np, C, HW), x_nchw.dtype),
        grid=(Np // nb,),
        in_specs=[
            pl.BlockSpec((nb, C, HW), lambda n: (n, 0, 0)),        # x (Nb elems/step)
            pl.BlockSpec((C, HP), lambda n: (0, 0), pipeline_mode=const_buf),
            pl.BlockSpec((HP, C), lambda n: (0, 0), pipeline_mode=const_buf),
            pl.BlockSpec((2 * HW, HW), lambda n: (0, 0), pipeline_mode=const_buf),
        ],
        out_specs=pl.BlockSpec((nb, C, HW), lambda n: (n, 0, 0)),
        compiler_params=pltpu.CompilerParams(
            dimension_semantics=("parallel",),
            vmem_limit_bytes=32 * 1024 * 1024),
    )(x_flat, w1p, w2p, conv_mat)

    return out_flat[:N].reshape(N, C, H, W)


def cbam_reference(x, f1_w, f2_w, conv_w):
    """Pure-JAX NCHW reference matching the PyTorch module."""
    w1 = f1_w[:, :, 0, 0]        # (hidden, C)
    w2 = f2_w[:, :, 0, 0]        # (C, hidden)

    avg = jnp.mean(x, axis=(2, 3))   # (N, C)
    mx = jnp.max(x, axis=(2, 3))     # (N, C)

    def mlp(v):
        h = jax.nn.relu(v @ w1.T)    # (N, hidden)
        return h @ w2.T              # (N, C)

    ca = jax.nn.sigmoid(mlp(avg) + mlp(mx))          # (N, C)
    x1 = x * ca[:, :, None, None]

    avg_s = jnp.mean(x1, axis=1, keepdims=True)
    max_s = jnp.max(x1, axis=1, keepdims=True)
    sp_in = jnp.concatenate([avg_s, max_s], axis=1)  # (N, 2, H, W)
    conv_out = jax.lax.conv_general_dilated(
        sp_in, conv_w, window_strides=(1, 1), padding=[(PAD, PAD), (PAD, PAD)],
        dimension_numbers=("NCHW", "OIHW", "NCHW"))
    sa = jax.nn.sigmoid(conv_out)                    # (N, 1, H, W)
    return x1 * sa


if __name__ == "__main__":
    N, C, H, W = 2, 32, 16, 16
    ratio = 16
    hidden = C // ratio          # = 2

    key = jax.random.PRNGKey(0)
    k1, k2, k3, k4 = jax.random.split(key, 4)
    x = jax.random.normal(k1, (N, C, H, W), jnp.float32)
    f1_w = jax.random.normal(k2, (hidden, C, 1, 1), jnp.float32) * 0.1
    f2_w = jax.random.normal(k3, (C, hidden, 1, 1), jnp.float32) * 0.1
    conv_w = jax.random.normal(k4, (1, 2, KSIZE, KSIZE), jnp.float32) * 0.1

    out = cbam_forward(x, f1_w, f2_w, conv_w)
    jax.block_until_ready(out)

    ref = cbam_reference(x, f1_w, f2_w, conv_w)
    assert out.shape == (N, C, H, W)
    err = jnp.max(jnp.abs(out - ref))
    # bf16 operands on the spatial-conv MXU matmul (f32 accumulation) -> ~1e-3
    # level absolute error vs. the f32 reference; tolerance relaxed accordingly.
    assert jnp.allclose(out, ref, atol=2e-2, rtol=2e-2), f"max err {err}"

    print("KERNEL_OK")
</pallas_src>

<mosaic_0001>
module attributes {stable_mosaic.version = 11 : i64} {
  func.func @cbam_kernel(%arg0: i32, %arg1: memref<8x32x256xf32, #tpu.memory_space<vmem>>, %arg2: memref<32x128xf32, #tpu.memory_space<vmem>>, %arg3: memref<128x32xf32, #tpu.memory_space<vmem>>, %arg4: memref<512x256xbf16, #tpu.memory_space<vmem>>, %arg5: memref<8x32x256xf32, #tpu.memory_space<vmem>>) attributes {dimension_semantics = [#tpu.dimension_semantics<parallel>], iteration_bounds = array<i64: 1>, scalar_prefetch = 0 : i64, scratch_operands = 0 : i64, tpu.core_type = #tpu.core_type<tc>, window_params = [{transform_indices = @transform_0, window_bounds = array<i64: 8, 32, 256>}, {pipeline_mode = #tpu.pipeline_mode<synchronous>, transform_indices = @transform_1, window_bounds = array<i64: 32, 128>}, {pipeline_mode = #tpu.pipeline_mode<synchronous>, transform_indices = @transform_2, window_bounds = array<i64: 128, 32>}, {pipeline_mode = #tpu.pipeline_mode<synchronous>, transform_indices = @transform_3, window_bounds = array<i64: 512, 256>}, {transform_indices = @transform_4, window_bounds = array<i64: 8, 32, 256>}]} {
    %c0 = arith.constant 0 : index
    %c0_0 = arith.constant 0 : index
    %c0_1 = arith.constant 0 : index
    %0 = vector.load %arg1[%c0, %c0_0, %c0_1] : memref<8x32x256xf32, #tpu.memory_space<vmem>>, vector<8x32x256xf32>
    %cst = arith.constant dense<0.000000e+00> : vector<8x32xf32>
    %1 = vector.multi_reduction <add>, %0, %cst [2] : vector<8x32x256xf32> to vector<8x32xf32>
    %cst_2 = arith.constant 2.560000e+02 : f32
    %2 = vector.broadcast %cst_2 : f32 to vector<8x32xf32>
    %3 = arith.divf %1, %2 : vector<8x32xf32>
    %cst_3 = arith.constant dense<0xFF800000> : vector<8x32xf32>
    %4 = vector.multi_reduction <maximumf>, %0, %cst_3 [2] : vector<8x32x256xf32> to vector<8x32xf32>
    %5 = tpu.concatenate %3, %4 in 0 : vector<8x32xf32>, vector<8x32xf32> -> vector<16x32xf32>
    %c0_4 = arith.constant 0 : index
    %c0_5 = arith.constant 0 : index
    %6 = vector.load %arg2[%c0_4, %c0_5] : memref<32x128xf32, #tpu.memory_space<vmem>>, vector<32x128xf32>
    %cst_6 = arith.constant dense<0.000000e+00> : vector<16x128xf32>
    %7 = tpu.matmul %5, %6, %cst_6 {dimension_numbers = #tpu.dot_dimension_numbers<[1], [0], [0], [1], [0, 0, 1, 1], [], []>} : vector<16x32xf32>, vector<32x128xf32>, vector<16x128xf32> -> vector<16x128xf32>
    %cst_7 = arith.constant 0.000000e+00 : f32
    %8 = vector.broadcast %cst_7 : f32 to vector<16x128xf32>
    %9 = arith.maximumf %7, %8 : vector<16x128xf32>
    %c0_8 = arith.constant 0 : index
    %c0_9 = arith.constant 0 : index
    %10 = vector.load %arg3[%c0_8, %c0_9] : memref<128x32xf32, #tpu.memory_space<vmem>>, vector<128x32xf32>
    %cst_10 = arith.constant dense<0.000000e+00> : vector<16x32xf32>
    %11 = tpu.matmul %9, %10, %cst_10 {dimension_numbers = #tpu.dot_dimension_numbers<[1], [0], [0], [1], [0, 0, 1, 1], [], []>} : vector<16x128xf32>, vector<128x32xf32>, vector<16x32xf32> -> vector<16x32xf32>
    %12 = vector.extract_strided_slice %11 {offsets = [0, 0], sizes = [8, 32], strides = [1, 1]} : vector<16x32xf32> to vector<8x32xf32>
    %13 = vector.extract_strided_slice %11 {offsets = [8, 0], sizes = [8, 32], strides = [1, 1]} : vector<16x32xf32> to vector<8x32xf32>
    %14 = arith.addf %12, %13 : vector<8x32xf32>
    %15 = arith.negf %14 : vector<8x32xf32>
    %16 = math.exp %15 : vector<8x32xf32>
    %cst_11 = arith.constant 1.000000e+00 : f32
    %17 = vector.broadcast %cst_11 : f32 to vector<8x32xf32>
    %18 = arith.addf %17, %16 : vector<8x32xf32>
    %19 = arith.divf %17, %18 : vector<8x32xf32>
    %20 = vector.shape_cast %19 : vector<8x32xf32> to vector<8x32x1xf32>
    %21 = vector.broadcast %20 : vector<8x32x1xf32> to vector<8x32x256xf32>
    %22 = arith.mulf %0, %21 : vector<8x32x256xf32>
    %cst_12 = arith.constant dense<0.000000e+00> : vector<8x256xf32>
    %23 = vector.multi_reduction <add>, %22, %cst_12 [1] : vector<8x32x256xf32> to vector<8x256xf32>
    %cst_13 = arith.constant 3.200000e+01 : f32
    %24 = vector.broadcast %cst_13 : f32 to vector<8x256xf32>
    %25 = arith.divf %23, %24 : vector<8x256xf32>
    %cst_14 = arith.constant dense<0xFF800000> : vector<8x256xf32>
    %26 = vector.multi_reduction <maximumf>, %22, %cst_14 [1] : vector<8x32x256xf32> to vector<8x256xf32>
    %27 = tpu.concatenate %25, %26 in 1 : vector<8x256xf32>, vector<8x256xf32> -> vector<8x512xf32>
    %28 = arith.truncf %27 : vector<8x512xf32> to vector<8x512xbf16>
    %c0_15 = arith.constant 0 : index
    %c0_16 = arith.constant 0 : index
    %29 = vector.load %arg4[%c0_15, %c0_16] : memref<512x256xbf16, #tpu.memory_space<vmem>>, vector<512x256xbf16>
    %cst_17 = arith.constant dense<0.000000e+00> : vector<8x256xf32>
    %30 = tpu.matmul %28, %29, %cst_17 {dimension_numbers = #tpu.dot_dimension_numbers<[1], [0], [0], [1], [0, 0, 1, 1], [], []>} : vector<8x512xbf16>, vector<512x256xbf16>, vector<8x256xf32> -> vector<8x256xf32>
    %31 = arith.negf %30 : vector<8x256xf32>
    %32 = math.exp %31 : vector<8x256xf32>
    %cst_18 = arith.constant 1.000000e+00 : f32
    %33 = vector.broadcast %cst_18 : f32 to vector<8x256xf32>
    %34 = arith.addf %33, %32 : vector<8x256xf32>
    %35 = arith.divf %33, %34 : vector<8x256xf32>
    %36 = vector.shape_cast %35 : vector<8x256xf32> to vector<8x1x256xf32>
    %37 = vector.broadcast %36 : vector<8x1x256xf32> to vector<8x32x256xf32>
    %38 = arith.mulf %22, %37 : vector<8x32x256xf32>
    %c0_19 = arith.constant 0 : index
    %c0_20 = arith.constant 0 : index
    %c0_21 = arith.constant 0 : index
    %39 = vector.load %arg5[%c0_19, %c0_20, %c0_21] : memref<8x32x256xf32, #tpu.memory_space<vmem>>, vector<8x32x256xf32>
    tpu.vector_store %arg5[%c0_19, %c0_20, %c0_21], %38 {strides = array<i32>} : memref<8x32x256xf32, #tpu.memory_space<vmem>>, vector<8x32x256xf32>,
    return
  }
  func.func @transform_0(%arg0: i32) -> (i32, i32, i32) {
    %c0_i32 = arith.constant 0 : i32
    %c0_i32_0 = arith.constant 0 : i32
    %c0_i32_1 = arith.constant 0 : i32
    return %arg0, %c0_i32, %c0_i32_0 : i32, i32, i32
  }
  func.func @transform_1(%arg0: i32) -> (i32, i32) {
    %c0_i32 = arith.constant 0 : i32
    %c0_i32_0 = arith.constant 0 : i32
    %c0_i32_1 = arith.constant 0 : i32
    return %c0_i32, %c0_i32_0 : i32, i32
  }
  func.func @transform_2(%arg0: i32) -> (i32, i32) {
    %c0_i32 = arith.constant 0 : i32
    %c0_i32_0 = arith.constant 0 : i32
    %c0_i32_1 = arith.constant 0 : i32
    return %c0_i32, %c0_i32_0 : i32, i32
  }
  func.func @transform_3(%arg0: i32) -> (i32, i32) {
    %c0_i32 = arith.constant 0 : i32
    %c0_i32_0 = arith.constant 0 : i32
    %c0_i32_1 = arith.constant 0 : i32
    return %c0_i32, %c0_i32_0 : i32, i32
  }
  func.func @transform_4(%arg0: i32) -> (i32, i32, i32) {
    %c0_i32 = arith.constant 0 : i32
    %c0_i32_0 = arith.constant 0 : i32
    %c0_i32_1 = arith.constant 0 : i32
    return %arg0, %c0_i32, %c0_i32_0 : i32, i32, i32
  }
}

</mosaic_0001>

<bundles_post_ra>
// kernel: tpu_custom_call.1
= control target key start
LH: loop header
LB: loop body
LE: loop exit
PB: predicated region body
PF: predicated region fallthrough
CT: control target
= control target key end

     0   :  { %9 = vsyncpa [#allocation3], 0  ;;  %s3707_s0 = inlined_call_operand.hbm [shape: f32[8,32,256], index: 0, kind: input, shape index: {}]   ;;  %s3708_s1 = inlined_call_operand.vmem [shape: f32[32,128], index: 1, kind: input, shape index: {}]   ;;  %s3709_s2 = inlined_call_operand.vmem [shape: f32[128,32], index: 2, kind: input, shape index: {}]   ;;  %s3710_s3 = inlined_call_operand.hbm [shape: bf16[512,256], index: 3, kind: input, shape index: {}]   ;;  %s3711_s4 = inlined_call_operand.hbm [shape: f32[8,32,256], index: 4, kind: output, shape index: {}]  }
   0x1   :  { %10 = vsyncpa [#allocation6], 0 }
   0x2   :  { %11 = vsyncpa [#allocation4], 0  ;;  %s2646_s15 = smov [#allocation2]  }
   0x3   :  { %s17_s16 = sshll.u32 %s2646_s15, 4  ;;  %s18_s16 = int_to_ptr.vmem [resolvable:$true] %s17_s16 }
   0x4   :  { %s2588_s17 = scalar_lea.vmem %s18_s16, 8192  ;;  %p2593_p1 = scmp.lt.s32.totalorder %s18_s16, %s18_s16 }
   0x5   :  { %p2589_p0 = scmp.ne.s32.totalorder %s18_s16, %s2588_s17  ;;  %p2594_p2 = scmp.lt.s32.totalorder %s2588_s17, %s2588_s17 }
   0x7   :  { %p2595_p3 = por %p2594_p2, %p2593_p1 }
   0x9   :  { %p2596_p4 = pnand %p2595_p3, %p2589_p0 }
   0xb   :  { %2599 = shalt.err (!%p2596_p4)
}
   0xc   :  { %s2647_s18 = smov 256   ;;  %s2648_s19 = smov 16  }
   0xd   :  { %23 = dma.hbm_to_vmem [thread:$0]  %s3707_s0, 8192, %s18_s16, [#allocation3], %s2647_s18, %s2647_s18, %s2648_s19  }
   0xe   :  { %s2649_s22 = smov [#allocation5]  }
   0xf   :  { %s33_s23 = sshll.u32 %s2649_s22, 4  ;;  %s34_s23 = int_to_ptr.vmem [resolvable:$true] %s33_s23 }
  0x10   :  { %s2608_s24 = scalar_lea.vmem %s34_s23, 8192  ;;  %p2613_p6 = scmp.lt.s32.totalorder %s34_s23, %s34_s23 }
  0x11   :  { %p2609_p5 = scmp.ne.s32.totalorder %s34_s23, %s2608_s24  ;;  %p2614_p7 = scmp.lt.s32.totalorder %s2608_s24, %s2608_s24 }
  0x13   :  { %p2615_p8 = por %p2614_p7, %p2613_p6 }
  0x15   :  { %p2616_p9 = pnand %p2615_p8, %p2609_p5 }
  0x17   :  { %2619 = shalt.err (!%p2616_p9)
}
  0x18   :  { %s2650_s25 = smov 128   ;;  %s2651_s26 = smov 8  }
  0x19   :  { %39 = dma.hbm_to_vmem [thread:$0]  %s3710_s3, 8192, %s34_s23, [#allocation6], %s2650_s25, %s2650_s25, %s2651_s26  }
  0x1a   :  { %2640 = dma.done.wait [#allocation3], 8192  }
  0x1b   :  { %2641 = vsyncadd [#allocation3], 4294959104 }
  0x1c   :  { %2642 = dma.done.wait [#allocation6], 8192  }
  0x1d   :  { %2643 = vsyncadd [#allocation6], 4294959104  ;;  %v2688_v0 = vld [vmem:[#allocation2 + $0x40] sm:$0xff]  ;;  %v2690_v1 = vld [vmem:[#allocation2 + $0x48] sm:$0xff]  ;;  %vm378_vm0 = vcmask 130112   ;;  %vm385_vm1 = vcmask 195712  }
  0x1e   :  { %v2692_v2 = vld [vmem:[#allocation2] sm:$0xff]  ;;  %v122_v3 = vadd.f32 %v2690_v1, %v2688_v0  ;;  %v2696_v4 = vld [vmem:[#allocation2 + $0x8] sm:$0xff]  ;;  %v2698_v5 = vld [vmem:[#allocation2 + $0x50] sm:$0xff]  ;;  %v251_v54 = vmax.f32 %v2688_v0, %v2690_v1  ;;  %vm392_vm2 = vcmask 261312   ;;  %vm527_vm3 = vcmask 1041409  }
  0x1f   :  { %v2700_v6 = vld [vmem:[#allocation2 + $0x58] sm:$0xff]  ;;  %v110_v7 = vadd.f32 %v2696_v4, %v2692_v2  ;;  %v2704_v8 = vld [vmem:[#allocation2 + $0x10] sm:$0xff]  ;;  %v2712_v12 = vld [vmem:[#allocation2 + $0x60] sm:$0xff]  ;;  %v239_v50 = vmax.f32 %v2692_v2, %v2696_v4  ;;  %vm529_vm4 = vcmask 1042434   ;;  %vm531_vm5 = vcmask 1043459  }
  0x20   :  { %v2706_v9 = vld [vmem:[#allocation2 + $0x18] sm:$0xff]  ;;  %123 = vadd.xlane.f32.xlu1 %v122_v3  ;;  %v125_v10 = vadd.f32 %v2700_v6, %v2698_v5  ;;  %v2714_v13 = vld [vmem:[#allocation2 + $0x68] sm:$0xff]  ;;  %v2716_v14 = vld [vmem:[#allocation2 + $0x20] sm:$0xff]  ;;  %v254_v61 = vmax.f32 %v2698_v5, %v2700_v6  ;;  %vm533_vm6 = vcmask 1044484   ;;  %vm535_vm7 = vcmask 1045509  }
  0x21   :  { %111 = vadd.xlane.f32.xlu0 %v110_v7  ;;  %v113_v11 = vadd.f32 %v2706_v9, %v2704_v8  ;;  %v2718_v15 = vld [vmem:[#allocation2 + $0x28] sm:$0xff]  ;;  %v128_v16 = vadd.f32 %v2714_v13, %v2712_v12  ;;  %v2724_v18 = vld [vmem:[#allocation2 + $0x90] sm:$0xff]  ;;  %v2726_v19 = vld [vmem:[#allocation2 + $0x98] sm:$0xff]  ;;  %v242_v55 = vmax.f32 %v2704_v8, %v2706_v9  ;;  %v257_v5 = vmax.f32 %v2712_v12, %v2714_v13 }
  0x22   :  { %v116_v17 = vadd.f32 %v2718_v15, %v2716_v14  ;;  %v2728_v20 = vld [vmem:[#allocation2 + $0x80] sm:$0xff]  ;;  %v2730_v21 = vld [vmem:[#allocation2 + $0x88] sm:$0xff]  ;;  %v137_v22 = vadd.f32 %v2726_v19, %v2724_v18  ;;  %v2736_v24 = vld [vmem:[#allocation2 + $0x70] sm:$0xff]  ;;  %v245_v2 = vmax.f32 %v2716_v14, %v2718_v15  ;;  %v266_v9 = vmax.f32 %v2724_v18, %v2726_v19 }
  0x23   :  { %v134_v23 = vadd.f32 %v2730_v21, %v2728_v20  ;;  %v2738_v25 = vld [vmem:[#allocation2 + $0x78] sm:$0xff]  ;;  %v2740_v26 = vld [vmem:[#allocation2 + $0x30] sm:$0xff]  ;;  %v2748_v30 = vld [vmem:[#allocation2 + $0xc0] sm:$0xff]  ;;  %v263_v4 = vmax.f32 %v2728_v20, %v2730_v21  ;;  %vm537_vm8 = vcmask 1046534   ;;  %vm539_vm9 = vcmask 1047559  }
  0x24   :  { %126 = vadd.xlane.f32.xlu1 %v125_v10  ;;  %v2742_v27 = vld [vmem:[#allocation2 + $0x38] sm:$0xff]  ;;  %v131_v28 = vadd.f32 %v2738_v25, %v2736_v24  ;;  %v2750_v31 = vld [vmem:[#allocation2 + $0xc8] sm:$0xff]  ;;  %v2752_v32 = vld [vmem:[#allocation2 + $0xa0] sm:$0xff]  ;;  %v260_v21 = vmax.f32 %v2736_v24, %v2738_v25  ;;  %vm736_vm10 = vcmask 261120  }
  0x25   :  { %114 = vadd.xlane.f32.xlu0 %v113_v11  ;;  %v119_v29 = vadd.f32 %v2742_v27, %v2740_v26  ;;  %v2754_v33 = vld [vmem:[#allocation2 + $0xa8] sm:$0xff]  ;;  %v146_v34 = vadd.f32 %v2750_v31, %v2748_v30  ;;  %v2760_v36 = vld [vmem:[#allocation2 + $0xb0] sm:$0xff]  ;;  %v2762_v37 = vld [vmem:[#allocation2 + $0xb8] sm:$0xff]  ;;  %v248_v18 = vmax.f32 %v2740_v26, %v2742_v27 }
  0x26   :  { %v140_v35 = vadd.f32 %v2754_v33, %v2752_v32  ;;  %v2764_v38 = vld [vmem:[#allocation2 + $0xd0] sm:$0xff]  ;;  %v2766_v39 = vld [vmem:[#allocation2 + $0xd8] sm:$0xff]  ;;  %v2768_v40 = vld [vmem:[#allocation2 + $0x100] sm:$0xff]  ;;  %v143_v42 = vadd.f32 %v2762_v37, %v2760_v36  ;;  %v269_v20 = vmax.f32 %v2752_v32, %v2754_v33 }
  0x27   :  { %v2770_v41 = vld [vmem:[#allocation2 + $0x108] sm:$0xff]  ;;  %v2774_v43 = vld [vmem:[#allocation2 + $0xe0] sm:$0xff]  ;;  %v149_v45 = vadd.f32 %v2766_v39, %v2764_v38  ;;  %v2782_v47 = vld [vmem:[#allocation2 + $0x110] sm:$0xff] }
  0x28   :  { %129 = vadd.xlane.f32.xlu1 %v128_v16  ;;  %v2776_v44 = vld [vmem:[#allocation2 + $0xe8] sm:$0xff]  ;;  %v158_v46 = vadd.f32 %v2770_v41, %v2768_v40  ;;  %v2784_v48 = vld [vmem:[#allocation2 + $0x118] sm:$0xff]  ;;  %v2792_v52 = vld [vmem:[#allocation2 + $0xf0] sm:$0xff] }
  0x29   :  { %117 = vadd.xlane.f32.xlu0 %v116_v17  ;;  %v152_v49 = vadd.f32 %v2776_v44, %v2774_v43  ;;  %v161_v51 = vadd.f32 %v2784_v48, %v2782_v47  ;;  %v2794_v53 = vld [vmem:[#allocation2 + $0xf8] sm:$0xff]  ;;  %v2800_v56 = vld [vmem:[#allocation2 + $0x140] sm:$0xff]  ;;  %v2802_v57 = vld [vmem:[#allocation2 + $0x148] sm:$0xff] }
  0x2a   :  { %v155_v58 = vadd.f32 %v2794_v53, %v2792_v52  ;;  %v2806_v59 = vld [vmem:[#allocation2 + $0x120] sm:$0xff]  ;;  %v2808_v60 = vld [vmem:[#allocation2 + $0x128] sm:$0xff]  ;;  %v170_v62 = vadd.f32 %v2802_v57, %v2800_v56  ;;  %v2816_v0 = vld [vmem:[#allocation2 + $0x150] sm:$0xff] }
  0x2b   :  { %v164_v63 = vadd.f32 %v2808_v60, %v2806_v59  ;;  %v2818_v1 = vld [vmem:[#allocation2 + $0x158] sm:$0xff]  ;;  %v2828_v6 = vld [vmem:[#allocation2 + $0x130] sm:$0xff]  ;;  %v2836_v10 = vld [vmem:[#allocation2 + $0x180] sm:$0xff] }
  0x2c   :  { %138 = vadd.xlane.f32.xlu1 %v137_v22  ;;  %v173_v3 = vadd.f32 %v2818_v1, %v2816_v0  ;;  %v2830_v7 = vld [vmem:[#allocation2 + $0x138] sm:$0xff]  ;;  %v2838_v11 = vld [vmem:[#allocation2 + $0x188] sm:$0xff]  ;;  %v2840_v14 = vld [vmem:[#allocation2 + $0x160] sm:$0xff]  ;;  %v278_v22 = vmax.f32 %v2764_v38, %v2766_v39  ;;  %v290_v39 = vmax.f32 %v2782_v47, %v2784_v48 }
  0x2d   :  { %135 = vadd.xlane.f32.xlu0 %v134_v23  ;;  %v167_v8 = vadd.f32 %v2830_v7, %v2828_v6  ;;  %v2842_v15 = vld [vmem:[#allocation2 + $0x168] sm:$0xff]  ;;  %v182_v12 = vadd.f32 %v2838_v11, %v2836_v10  ;;  %v2848_v16 = vld [vmem:[#allocation2 + $0x190] sm:$0xff]  ;;  %v2850_v17 = vld [vmem:[#allocation2 + $0x198] sm:$0xff]  ;;  %v275_v23 = vmax.f32 %v2748_v30, %v2750_v31  ;;  %v281_v30 = vmax.f32 %v2774_v43, %v2776_v44 }
  0x2e   :  { %v176_v13 = vadd.f32 %v2842_v15, %v2840_v14  ;;  %v185_v19 = vadd.f32 %v2850_v17, %v2848_v16  ;;  %v98_v26 = vld [vmem:[#allocation2 + $0x1a0] sm:$0xff]  ;;  %v99_v27 = vld [vmem:[#allocation2 + $0x1a8] sm:$0xff]  ;;  %v104_v33 = vld [vmem:[#allocation2 + $0x1d0] sm:$0xff]  ;;  %v272_v31 = vmax.f32 %v2760_v36, %v2762_v37  ;;  %v293_v36 = vmax.f32 %v2806_v59, %v2808_v60 }
  0x2f   :  { %v103_v24 = vld [vmem:[#allocation2 + $0x1c8] sm:$0xff]  ;;  %v284_v37 = vmax.f32 %v2792_v52, %v2794_v53  ;;  %v108_v44 = vld [vmem:[#allocation2 + $0x1f0] sm:$0xff]  ;;  %v109_v47 = vld [vmem:[#allocation2 + $0x1f8] sm:$0xff]  ;;  %v296_v48 = vmax.f32 %v2828_v6, %v2830_v7  ;;  %v311_v52 = vmax.f32 %v2836_v10, %v2838_v11  ;;  %v305_v53 = vmax.f32 %v2840_v14, %v2842_v15 }
  0x30   :  { %132 = vadd.xlane.f32.xlu1 %v131_v28  ;;  %v92_v28 = vld [vmem:[#allocation2 + $0x170] sm:$0xff]  ;;  %v317_v59 = vmax.f32 %v98_v26, %v99_v27 }
  0x31   :  { %120 = vadd.xlane.f32.xlu0 %v119_v29  ;;  %v93_v29 = vld [vmem:[#allocation2 + $0x178] sm:$0xff] }
  0x32   :  { %v179_v32 = vadd.f32 %v93_v29, %v92_v28 }
  0x34   :  { %147 = vadd.xlane.f32.xlu1 %v146_v34  ;;  %v188_v34 = vadd.f32 %v99_v27, %v98_v26  ;;  %v830_v27 = vld [vmem:[%s3709_s2 + $0x60] sm:$0xff] }
  0x35   :  { %141 = vadd.xlane.f32.xlu0 %v140_v35  ;;  %v105_v35 = vld [vmem:[#allocation2 + $0x1d8] sm:$0xff] }
  0x36   :  { %v197_v25 = vadd.f32 %v105_v35, %v104_v33 }
  0x38   :  { %144 = vadd.xlane.f32.xlu1 %v143_v42  ;;  %v102_v42 = vld [vmem:[#allocation2 + $0x1c0] sm:$0xff] }
  0x39   :  { %150 = vadd.xlane.f32.xlu0 %v149_v45  ;;  %v194_v38 = vadd.f32 %v103_v24, %v102_v42  ;;  %v287_v45 = vmax.f32 %v2768_v40, %v2770_v41  ;;  %v302_v40 = vmax.f32 %v2816_v0, %v2818_v1  ;;  %v299_v41 = vmax.f32 %v2800_v56, %v2802_v57  ;;  %v735_v1 = vld [vmem:[%s3708_s1 + $0x18] sm:$0xff] }
  0x3a   :  { %v314_v56 = vmax.f32 %v2848_v16, %v2850_v17  ;;  %v323_v57 = vmax.f32 %v102_v42, %v103_v24  ;;  %v367_v0 = vlaneseq  ;;  %2354 = vmatprep.subr.mxu0 %v735_v1  ;;  %v829_v42 = vld [vmem:[%s3709_s2 + $0x58] sm:$0xff] }
  0x3b   :  { %2355 = vmatpush3.msra.mxu0 %v735_v1 }
  0x3c   :  { %159 = vadd.xlane.f32.xlu1 %v158_v46  ;;  %v106_v46 = vld [vmem:[#allocation2 + $0x1e0] sm:$0xff] }
  0x3d   :  { %153 = vadd.xlane.f32.xlu0 %v152_v49  ;;  %v107_v49 = vld [vmem:[#allocation2 + $0x1e8] sm:$0xff] }
  0x40   :  { %240 = vmax.xlane.f32.xlu1 %v239_v50  ;;  %v100_v50 = vld [vmem:[#allocation2 + $0x1b0] sm:$0xff] }
  0x41   :  { %162 = vadd.xlane.f32.xlu0 %v161_v51  ;;  %v101_v51 = vld [vmem:[#allocation2 + $0x1b8] sm:$0xff] }
  0x42   :  { %v191_v43 = vadd.f32 %v101_v51, %v100_v50  ;;  %v320_v60 = vmax.f32 %v100_v50, %v101_v51  ;;  %v827_v51 = vld [vmem:[%s3709_s2 + $0x48] sm:$0xff] }
  0x44   :  { %252 = vmax.xlane.f32.xlu1 %v251_v54  ;;  %v200_v54 = vadd.f32 %v107_v49, %v106_v46 }
  0x45   :  { %243 = vmax.xlane.f32.xlu0 %v242_v55  ;;  %v203_v55 = vadd.f32 %v109_v47, %v108_v44 }
  0x48   :  { %156 = vadd.xlane.f32.xlu1 %v155_v58  ;;  %v308_v58 = vmax.f32 %v92_v28, %v93_v29 }
  0x49   :  { %255 = vmax.xlane.f32.xlu0 %v254_v61  ;;  %v326_v61 = vmax.f32 %v104_v33, %v105_v35 }
  0x4c   :  { %171 = vadd.xlane.f32.xlu1 %v170_v62  ;;  %v332_v62 = vmax.f32 %v108_v44, %v109_v47 }
  0x4d   :  { %165 = vadd.xlane.f32.xlu0 %v164_v63  ;;  %v329_v63 = vmax.f32 %v106_v46, %v107_v49 }
  0x50   :  { %246 = vmax.xlane.f32.xlu1 %v245_v2  ;;  %v734_v2 = vld [vmem:[%s3708_s1 + $0x10] sm:$0xff] }
  0x51   :  { %174 = vadd.xlane.f32.xlu0 %v173_v3  ;;  %v368_v3 = vand.u32 127, %v367_v0  ;;  %2356 = vmatprep.subr.mxu0 %v734_v2 }
  0x52   :  { %2357 = vmatpush3.msra.mxu0 %v734_v2  ;;  %v822_v2 = vld [vmem:[%s3709_s2 + $0x20] sm:$0xff] }
  0x53   :  { %v373_v6 = vadd.s32 4294967288, %v368_v3  ;;  %v380_v15 = vadd.s32 4294967280, %v368_v3 }
  0x54   :  { %264 = vmax.xlane.f32.xlu1 %v263_v4  ;;  %v733_v4 = vld [vmem:[%s3708_s1 + $0x8] sm:$0xff] }
  0x55   :  { %258 = vmax.xlane.f32.xlu0 %v257_v5  ;;  %v2897_v5 = vshrl.u32 %v367_v0, 7  ;;  %2358 = vmatprep.subr.mxu0 %v733_v4 }
  0x56   :  { %2359 = vmatpush3.msra.mxu0 %v733_v4 }
  0x57   :  { %v2903_v10 = vsub.s32 %v368_v3, %v2897_v5  ;;  %v2906_v14 = vsub.s32 %v373_v6, %v2897_v5  ;;  %v2920_v26 = vsub.s32 %v380_v15, %v2897_v5 }
  0x58   :  { %168 = vadd.xlane.f32.xlu1 %v167_v8  ;;  %v732_v8 = vld [vmem:[%s3708_s1] sm:$0xff] }
  0x59   :  { %267 = vmax.xlane.f32.xlu0 %v266_v9  ;;  %2360 = vmatprep.subr.mxu0 %v732_v8 }
  0x5a   :  { %2361 = vmatpush3.msra.mxu0 %v732_v8 }
  0x5c   :  { %183 = vadd.xlane.f32.xlu1 %v182_v12  ;;  %v833_v12 = vld [vmem:[%s3709_s2 + $0x78] sm:$0xff] }
  0x5d   :  { %177 = vadd.xlane.f32.xlu0 %v176_v13  ;;  %v832_v13 = vld [vmem:[%s3709_s2 + $0x70] sm:$0xff]  ;;  %2365 = vmatprep.subr.mxu1 %v833_v12 }
  0x5e   :  { %2366 = vmatpush3.msra.mxu1 %v833_v12 }
  0x5f   :  { %2367 = vmatprep.subr.mxu1 %v832_v13 }
  0x60   :  { %249 = vmax.xlane.f32.xlu1 %v248_v18  ;;  %2368 = vmatpush3.msra.mxu1 %v832_v13 }
  0x61   :  { %186 = vadd.xlane.f32.xlu0 %v185_v19 }
  0x64   :  { %270 = vmax.xlane.f32.xlu1 %v269_v20  ;;  %v831_v20 = vld [vmem:[%s3709_s2 + $0x68] sm:$0xff] }
  0x65   :  { %261 = vmax.xlane.f32.xlu0 %v260_v21  ;;  %2369 = vmatprep.subr.mxu1 %v831_v20 }
  0x66   :  { %2370 = vmatpush3.msra.mxu1 %v831_v20 }
  0x67   :  { %2371 = vmatprep.subr.mxu1 %v830_v27 }
  0x68   :  { %279 = vmax.xlane.f32.xlu1 %v278_v22  ;;  %2372 = vmatpush3.msra.mxu1 %v830_v27 }
  0x69   :  { %276 = vmax.xlane.f32.xlu0 %v275_v23  ;;  %2373 = vmatprep.subr.mxu1 %v829_v42 }
  0x6a   :  { %2374 = vmatpush3.msra.mxu1 %v829_v42 }
  0x6c   :  { %189 = vadd.xlane.f32.xlu1 %v188_v34 }
  0x6d   :  { %180 = vadd.xlane.f32.xlu0 %v179_v32 }
  0x70   :  { %198 = vadd.xlane.f32.xlu1 %v197_v25 }
  0x71   :  { %195 = vadd.xlane.f32.xlu0 %v194_v38 }
  0x74   :  { %282 = vmax.xlane.f32.xlu1 %v281_v30  ;;  %v387_v30 = vadd.s32 4294967272, %v368_v3 }
  0x75   :  { %273 = vmax.xlane.f32.xlu0 %v272_v31  ;;  %v828_v31 = vld [vmem:[%s3709_s2 + $0x50] sm:$0xff] }
  0x76   :  { %2375 = vmatprep.subr.mxu1 %v828_v31 }
  0x77   :  { %2376 = vmatpush3.msra.mxu1 %v828_v31 }
  0x78   :  { %291 = vmax.xlane.f32.xlu1 %v290_v39  ;;  %2377 = vmatprep.subr.mxu1 %v827_v51 }
  0x79   :  { %288 = vmax.xlane.f32.xlu0 %v287_v45  ;;  %2378 = vmatpush3.msra.mxu1 %v827_v51 }
  0x7c   :  { %201 = vadd.xlane.f32.xlu1 %v200_v54 }
  0x7d   :  { %192 = vadd.xlane.f32.xlu0 %v191_v43 }
  0x80   :  { %294 = vmax.xlane.f32.xlu1 %v293_v36 }
  0x81   :  { %285 = vmax.xlane.f32.xlu0 %v284_v37  ;;  %v2944_v37 = vsub.s32 %v387_v30, %v2897_v5 }
  0x84   :  { %303 = vmax.xlane.f32.xlu1 %v302_v40  ;;  %v826_v40 = vld [vmem:[%s3709_s2 + $0x40] sm:$0xff] }
  0x85   :  { %300 = vmax.xlane.f32.xlu0 %v299_v41  ;;  %2379 = vmatprep.subr.mxu1 %v826_v40 }
  0x86   :  { %2380 = vmatpush3.msra.mxu1 %v826_v40 }
  0x88   :  { %297 = vmax.xlane.f32.xlu1 %v296_v48 }
  0x89   :  { %204 = vadd.xlane.f32.xlu0 %v203_v55  ;;  %v825_v55 = vld [vmem:[%s3709_s2 + $0x38] sm:$0xff] }
  0x8a   :  { %2381 = vmatprep.subr.mxu1 %v825_v55 }
  0x8b   :  { %2382 = vmatpush3.msra.mxu1 %v825_v55 }
  0x8c   :  { %312 = vmax.xlane.f32.xlu1 %v311_v52 }
  0x8d   :  { %306 = vmax.xlane.f32.xlu0 %v305_v53 }
  0x90   :  { %309 = vmax.xlane.f32.xlu1 %v308_v58 }
  0x91   :  { %315 = vmax.xlane.f32.xlu0 %v314_v56  ;;  %v824_v56 = vld [vmem:[%s3709_s2 + $0x30] sm:$0xff] }
  0x92   :  { %2383 = vmatprep.subr.mxu1 %v824_v56 }
  0x93   :  { %2384 = vmatpush3.msra.mxu1 %v824_v56 }
  0x94   :  { %324 = vmax.xlane.f32.xlu1 %v323_v57 }
  0x95   :  { %318 = vmax.xlane.f32.xlu0 %v317_v59 }
  0x98   :  { %321 = vmax.xlane.f32.xlu1 %v320_v60 }
  0x99   :  { %327 = vmax.xlane.f32.xlu0 %v326_v61 }
  0x9c   :  { %333 = vmax.xlane.f32.xlu1 %v332_v62  ;;  %v823_v62 = vld [vmem:[%s3709_s2 + $0x28] sm:$0xff] }
  0x9d   :  { %330 = vmax.xlane.f32.xlu0 %v329_v63  ;;  %2385 = vmatprep.subr.mxu1 %v823_v62 }
  0x9e   :  { %2386 = vmatpush3.msra.mxu1 %v823_v62 }
  0x9f   :  { %2387 = vmatprep.subr.mxu1 %v822_v2 }
  0xa0   :  { %2388 = vmatpush3.msra.mxu1 %v822_v2 }
  0xa9   :  { %v124_v7 = vpop.xlane.xlu1 %123 }
  0xaa   :  { %v112_v9 = vpop.xlane.xlu0 %111  ;;  %v211_v11 = vmul.f32 0.00390625, %v124_v7 }
  0xab   :  { %v207_v16 = vmul.f32 0.00390625, %v112_v9  ;;  %v821_v9 = vld [vmem:[%s3709_s2 + $0x18] sm:$0xff] }
  0xac   :  { %v397_v22 = vrot.slane %v211_v11, %v2903_v10  ;;  %2389 = vmatprep.subr.mxu1 %v821_v9 }
  0xad   :  { %v127_v17 = vpop.xlane.xlu1 %126  ;;  %v372_v28 = vrot.slane %v207_v16, %v2903_v10  ;;  %2390 = vmatpush3.msra.mxu1 %v821_v9 }
  0xae   :  { %v212_v18 = vmul.f32 0.00390625, %v127_v17  ;;  %v115_v19 = vpop.xlane.xlu0 %114 }
  0xaf   :  { %v208_v21 = vmul.f32 0.00390625, %v115_v19 }
  0xb0   :  { %v401_v23 = vrot.slane %v212_v18, %v2906_v14 }
  0xb1   :  { %v377_v29 = vrot.slane %v208_v21, %v2906_v14  ;;  %v130_v34 = vpop.xlane.xlu1 %129 }
  0xb2   :  { %v402_v32 = vsel %vm378_vm0, %v401_v23, %v397_v22  ;;  %v213_v33 = vmul.f32 0.00390625, %v130_v34  ;;  %v118_v35 = vpop.xlane.xlu0 %117 }
  0xb3   :  { %v379_v24 = vsel %vm378_vm0, %v377_v29, %v372_v28  ;;  %v209_v25 = vmul.f32 0.00390625, %v118_v35 }
  0xb4   :  { %v406_v38 = vrot.slane %v213_v33, %v2920_v26 }
  0xb5   :  { %v384_v39 = vrot.slane %v209_v25, %v2920_v26  ;;  %v139_v45 = vpop.xlane.xlu1 %138 }
  0xb6   :  { %v407_v46 = vsel %vm385_vm1, %v406_v38, %v402_v32  ;;  %v216_v49 = vmul.f32 0.00390625, %v139_v45  ;;  %v136_v50 = vpop.xlane.xlu0 %135 }
  0xb7   :  { %v386_v54 = vsel %vm385_vm1, %v384_v39, %v379_v24  ;;  %v215_v43 = vmul.f32 0.00390625, %v136_v50 }
  0xb8   :  { %v420_v36 = vrot.slane %v216_v49, %v2906_v14 }
  0xb9   :  { %v416_v41 = vrot.slane %v215_v43, %v2903_v10  ;;  %v133_v44 = vpop.xlane.xlu1 %132 }
  0xba   :  { %v214_v47 = vmul.f32 0.00390625, %v133_v44  ;;  %v121_v48 = vpop.xlane.xlu0 %120 }
  0xbb   :  { %v421_v52 = vsel %vm378_vm0, %v420_v36, %v416_v41  ;;  %v210_v53 = vmul.f32 0.00390625, %v121_v48 }
  0xbc   :  { %v411_v58 = vrot.slane %v214_v47, %v2944_v37 }
  0xbd   :  { %v391_v57 = vrot.slane %v210_v53, %v2944_v37  ;;  %v148_v59 = vpop.xlane.xlu1 %147 }
  0xbe   :  { %v412_v60 = vsel %vm392_vm2, %v411_v58, %v407_v46  ;;  %v142_v61 = vpop.xlane.xlu0 %141  ;;  %v219_v3 = vmul.f32 0.00390625, %v148_v59 }
  0xbf   :  { %v393_v63 = vsel %vm392_vm2, %v391_v57, %v386_v54  ;;  %v217_v0 = vmul.f32 0.00390625, %v142_v61 }
  0xc0   :  { %v528_v1 = vsel %vm527_vm3, %v412_v60, %v393_v63  ;;  %v435_v13 = vrot.slane %v219_v3, %v2903_v10 }
  0xc1   :  { %v425_v4 = vrot.slane %v217_v0, %v2920_v26  ;;  %v145_v6 = vpop.xlane.xlu1 %144 }
  0xc2   :  { %v218_v7 = vmul.f32 0.00390625, %v145_v6  ;;  %v151_v8 = vpop.xlane.xlu0 %150 }
  0xc3   :  { %v426_v11 = vsel %vm385_vm1, %v425_v4, %v421_v52  ;;  %v220_v15 = vmul.f32 0.00390625, %v151_v8 }
  0xc4   :  { %v430_v12 = vrot.slane %v218_v7, %v2944_v37 }
  0xc5   :  { %v439_v16 = vrot.slane %v220_v15, %v2906_v14  ;;  %v160_v17 = vpop.xlane.xlu1 %159 }
  0xc6   :  { %v431_v18 = vsel %vm392_vm2, %v430_v12, %v426_v11  ;;  %v154_v19 = vpop.xlane.xlu0 %153  ;;  %v223_v23 = vmul.f32 0.00390625, %v160_v17 }
  0xc7   :  { %v530_v20 = vsel %vm529_vm4, %v431_v18, %v528_v1  ;;  %v440_v21 = vsel %vm378_vm0, %v439_v16, %v435_v13  ;;  %v221_v22 = vmul.f32 0.00390625, %v154_v19 }
  0xc8   :  { %v454_v33 = vrot.slane %v223_v23, %v2903_v10 }
  0xc9   :  { %v444_v27 = vrot.slane %v221_v22, %v2920_v26  ;;  %v241_v28 = vpop.xlane.xlu1 %240 }
  0xca   :  { %v163_v29 = vpop.xlane.xlu0 %162  ;;  %v576_v25 = vrot.slane %v241_v28, %v2903_v10 }
  0xcb   :  { %v445_v34 = vsel %vm385_vm1, %v444_v27, %v440_v21  ;;  %v224_v32 = vmul.f32 0.00390625, %v163_v29 }
  0xcd   :  { %v458_v35 = vrot.slane %v224_v32, %v2906_v14  ;;  %v253_v42 = vpop.xlane.xlu1 %252 }
  0xce   :  { %v244_v24 = vpop.xlane.xlu0 %243  ;;  %v595_v49 = vrot.slane %v253_v42, %v2903_v10 }
  0xcf   :  { %v459_v38 = vsel %vm378_vm0, %v458_v35, %v454_v33  ;;  %v580_v30 = vrot.slane %v244_v24, %v2906_v14 }
  0xd1   :  { %v581_v31 = vsel %vm378_vm0, %v580_v30, %v576_v25  ;;  %v157_v39 = vpop.xlane.xlu1 %156 }
  0xd2   :  { %v222_v45 = vmul.f32 0.00390625, %v157_v39  ;;  %v256_v46 = vpop.xlane.xlu0 %255 }
  0xd3   :  { %v599_v50 = vrot.slane %v256_v46, %v2906_v14 }
  0xd4   :  { %v449_v51 = vrot.slane %v222_v45, %v2944_v37 }
  0xd5   :  { %v600_v54 = vsel %vm378_vm0, %v599_v50, %v595_v49  ;;  %v172_v43 = vpop.xlane.xlu1 %171 }
  0xd6   :  { %v450_v36 = vsel %vm392_vm2, %v449_v51, %v445_v34  ;;  %v166_v40 = vpop.xlane.xlu0 %165  ;;  %v227_v51 = vmul.f32 0.00390625, %v172_v43 }
  0xd7   :  { %v532_v41 = vsel %vm531_vm5, %v450_v36, %v530_v20  ;;  %v225_v52 = vmul.f32 0.00390625, %v166_v40 }
  0xd9   :  { %v247_v44 = vpop.xlane.xlu1 %246  ;;  %v463_v57 = vrot.slane %v225_v52, %v2920_v26 }
  0xda   :  { %v585_v47 = vrot.slane %v247_v44, %v2920_v26  ;;  %v175_v48 = vpop.xlane.xlu0 %174 }
  0xdb   :  { %v464_v0 = vsel %vm385_vm1, %v463_v57, %v459_v38  ;;  %v228_v39 = vmul.f32 0.00390625, %v175_v48  ;;  %v473_v57 = vrot.slane %v227_v51, %v2903_v10 }
  0xdc   :  { %v586_v55 = vsel %vm385_vm1, %v585_v47, %v581_v31 }
  0xdd   :  { %v265_v53 = vpop.xlane.xlu1 %264  ;;  %v477_v44 = vrot.slane %v228_v39, %v2906_v14 }
  0xde   :  { %v259_v58 = vpop.xlane.xlu0 %258  ;;  %v614_v28 = vrot.slane %v265_v53, %v2903_v10 }
  0xdf   :  { %v604_v56 = vrot.slane %v259_v58, %v2920_v26 }
  0xe1   :  { %v605_v59 = vsel %vm385_vm1, %v604_v56, %v600_v54  ;;  %v169_v60 = vpop.xlane.xlu1 %168 }
  0xe2   :  { %v226_v61 = vmul.f32 0.00390625, %v169_v60  ;;  %v268_v62 = vpop.xlane.xlu0 %267 }
  0xe3   :  { %v618_v23 = vrot.slane %v268_v62, %v2906_v14  ;;  %v478_v62 = vsel %vm378_vm0, %v477_v44, %v473_v57 }
  0xe4   :  { %v468_v63 = vrot.slane %v226_v61, %v2944_v37 }
  0xe5   :  { %v184_v1 = vpop.xlane.xlu1 %183  ;;  %v619_v32 = vsel %vm378_vm0, %v618_v23, %v614_v28 }
  0xe6   :  { %v469_v2 = vsel %vm392_vm2, %v468_v63, %v464_v0  ;;  %v178_v3 = vpop.xlane.xlu0 %177  ;;  %v231_v40 = vmul.f32 0.00390625, %v184_v1 }
  0xe7   :  { %v3002_v4 = vsel %vm533_vm6, %v469_v2, %v532_v41  ;;  %v229_v46 = vmul.f32 0.00390625, %v178_v3 }
  0xe8   :  { %v492_v60 = vrot.slane %v231_v40, %v2903_v10 }
  0xe9   :  { %v250_v6 = vpop.xlane.xlu1 %249  ;;  %v482_v53 = vrot.slane %v229_v46, %v2920_v26 }
  0xea   :  { %v187_v7 = vpop.xlane.xlu0 %186  ;;  %v590_v8 = vrot.slane %v250_v6, %v2944_v37 }
  0xeb   :  { %v232_v49 = vmul.f32 0.00390625, %v187_v7  ;;  %v483_v2 = vsel %vm385_vm1, %v482_v53, %v478_v62 }
  0xec   :  { %v591_v12 = vsel %vm392_vm2, %v590_v8, %v586_v55 }
  0xed   :  { %v271_v9 = vpop.xlane.xlu1 %270  ;;  %v496_v48 = vrot.slane %v232_v49, %v2906_v14 }
  0xee   :  { %v262_v11 = vpop.xlane.xlu0 %261  ;;  %v623_v27 = vrot.slane %v271_v9, %v2920_v26 }
  0xef   :  { %v609_v15 = vrot.slane %v262_v11, %v2944_v37  ;;  %v497_v3 = vsel %vm378_vm0, %v496_v48, %v492_v60 }
  0xf0   :  { %v624_v35 = vsel %vm385_vm1, %v623_v27, %v619_v32 }
  0xf1   :  { %v610_v13 = vsel %vm392_vm2, %v609_v15, %v605_v59  ;;  %v3008_v16 = vpop.xlane.xlu1 %279 }
  0xf2   :  { %v725_v17 = vsel %vm527_vm3, %v610_v13, %v591_v12  ;;  %v3011_v18 = vpop.xlane.xlu0 %276 }
  0xf5   :  { %v190_v19 = vpop.xlane.xlu1 %189 }
  0xf6   :  { %v181_v20 = vpop.xlane.xlu0 %180  ;;  %v233_v54 = vmul.f32 0.00390625, %v190_v19 }
  0xf7   :  { %v230_v36 = vmul.f32 0.00390625, %v181_v20 }
  0xf8   :  { %v501_v43 = vrot.slane %v233_v54, %v2920_v26 }
  0xf9   :  { %v199_v21 = vpop.xlane.xlu1 %198  ;;  %v487_v59 = vrot.slane %v230_v36, %v2944_v37 }
  0xfa   :  { %v196_v22 = vpop.xlane.xlu0 %195  ;;  %v236_v47 = vmul.f32 0.00390625, %v199_v21  ;;  %v502_v8 = vsel %vm385_vm1, %v501_v43, %v497_v3 }
  0xfb   :  { %v235_v55 = vmul.f32 0.00390625, %v196_v22  ;;  %v488_v9 = vsel %vm392_vm2, %v487_v59, %v483_v2 }
  0xfc   :  { %v515_v63 = vrot.slane %v236_v47, %v2906_v14  ;;  %v536_v21 = vsel %vm535_vm7, %v488_v9, %v3002_v4 }
  0xfd   :  { %v3016_v29 = vpop.xlane.xlu1 %282  ;;  %v511_v0 = vrot.slane %v235_v55, %v2903_v10 }
  0xfe   :  { %v274_v34 = vpop.xlane.xlu0 %273  ;;  %v642_v4 = vrot.slane %v3016_v29, %v2920_v26 }
  0xff   :  { %v628_v33 = vrot.slane %v274_v34, %v2944_v37  ;;  %v516_v12 = vsel %vm378_vm0, %v515_v63, %v511_v0 }
 0x101   :  { %v629_v42 = vsel %vm392_vm2, %v628_v33, %v624_v35  ;;  %v3022_v24 = vpop.xlane.xlu1 %291  ;;  %v637_v33 = vrot.slane %v3008_v16, %v2906_v14  ;;  %v633_v35 = vrot.slane %v3011_v18, %v2903_v10 }
 0x102   :  { %v3025_v25 = vsel %vm529_vm4, %v629_v42, %v725_v17  ;;  %v3027_v38 = vpop.xlane.xlu0 %288 }
 0x105   :  { %v202_v30 = vpop.xlane.xlu1 %201 }
 0x106   :  { %v193_v31 = vpop.xlane.xlu0 %192  ;;  %v237_v58 = vmul.f32 0.00390625, %v202_v30  ;;  %v656_v30 = vrot.slane %v3022_v24, %v2906_v14 }
 0x107   :  { %v234_v41 = vmul.f32 0.00390625, %v193_v31  ;;  %v652_v31 = vrot.slane %v3027_v38, %v2903_v10  ;;  %v638_v38 = vsel %vm378_vm0, %v637_v33, %v633_v35 }
 0x108   :  { %v520_v6 = vrot.slane %v237_v58, %v2920_v26 }
 0x109   :  { %v3029_v45 = vpop.xlane.xlu1 %294  ;;  %v506_v61 = vrot.slane %v234_v41, %v2944_v37  ;;  %v657_v40 = vsel %vm378_vm0, %v656_v30, %v652_v31  ;;  %v2408_v30 = vld [vmem:[#allocation5 + $0x170] ss:$8 sps:$4 sm:$0xff]   ;;  %v2413_v31 = vld [vmem:[#allocation5 + $0x74] ss:$8 sps:$4 sm:$0xff]  }
 0x10a   :  { %v3031_v50 = vpop.xlane.xlu0 %285  ;;  %v521_v20 = vsel %vm385_vm1, %v520_v6, %v516_v12  ;;  %v661_v39 = vrot.slane %v3029_v45, %v2920_v26  ;;  %1889 = vmatprep.subr.bf16.mxu0 %v2413_v31  ;;  %v2491_v31 = vld [vmem:[#allocation5 + $0xa4] ss:$8 sps:$4 sm:$0xff]  }
 0x10b   :  { %v507_v15 = vsel %vm392_vm2, %v506_v61, %v502_v8  ;;  %v647_v46 = vrot.slane %v3031_v50, %v2944_v37  ;;  %v643_v50 = vsel %vm385_vm1, %v642_v4, %v638_v38  ;;  %v818_v8 = vld [vmem:[%s3709_s2] sm:$0xff]  ;;  %v2410_v4 = vld [vmem:[#allocation5 + $0x174] ss:$8 sps:$4 sm:$0xff]   ;;  %v2420_v38 = vld [vmem:[#allocation5 + $0x150] ss:$8 sps:$4 sm:$0xff]  }
 0x10c   :  { %v538_v23 = vsel %vm537_vm8, %v507_v15, %v536_v21  ;;  %v662_v47 = vsel %vm385_vm1, %v661_v39, %v657_v40  ;;  %v2411_v39 = vld [vmem:[#allocation5 + $0x70] ss:$8 sps:$4 sm:$0xff]  }
 0x10d   :  { %v3034_v52 = vpop.xlane.xlu1 %303  ;;  %v648_v55 = vsel %vm392_vm2, %v647_v46, %v643_v50  ;;  %v1013_v50 = vsub.s32 5, %v2897_v5 }
 0x10e   :  { %v301_v56 = vpop.xlane.xlu0 %300  ;;  %v675_v16 = vrot.slane %v3034_v52, %v2906_v14  ;;  %v727_v63 = vsel %vm531_vm5, %v648_v55, %v3025_v25  ;;  %v819_v25 = vld [vmem:[%s3709_s2 + $0x8] sm:$0xff] }
 0x10f   :  { %v671_v18 = vrot.slane %v301_v56, %v2903_v10  ;;  %v2431_v55 = vld [vmem:[#allocation5 + $0x44] ss:$8 sps:$4 sm:$0xff]  }
 0x111   :  { %v298_v1 = vpop.xlane.xlu1 %297  ;;  %v676_v52 = vsel %vm378_vm0, %v675_v16, %v671_v18  ;;  %v2416_v16 = vld [vmem:[#allocation5 + $0x164] ss:$8 sps:$4 sm:$0xff]   ;;  %v2414_v18 = vld [vmem:[#allocation5 + $0x160] ss:$8 sps:$4 sm:$0xff]  }
 0x112   :  { %v205_v7 = vpop.xlane.xlu0 %204  ;;  %v666_v49 = vrot.slane %v298_v1, %v2944_v37 }
 0x113   :  { %v238_v11 = vmul.f32 0.00390625, %v205_v7 }
 0x114   :  { %v667_v48 = vsel %vm392_vm2, %v666_v49, %v662_v47  ;;  %v2419_v49 = vld [vmem:[#allocation5 + $0x64] ss:$8 sps:$4 sm:$0xff]   ;;  %v2426_v47 = vld [vmem:[#allocation5 + $0x140] ss:$8 sps:$4 sm:$0xff]  }
 0x115   :  { %v525_v13 = vrot.slane %v238_v11, %v2944_v37  ;;  %v313_v17 = vpop.xlane.xlu1 %312  ;;  %v728_v1 = vsel %vm533_vm6, %v667_v48, %v727_v63  ;;  %v2434_v48 = vld [vmem:[#allocation5 + $0x134] ss:$8 sps:$4 sm:$0xff]  }
 0x116   :  { %v307_v19 = vpop.xlane.xlu0 %306  ;;  %v690_v41 = vrot.slane %v313_v17, %v2903_v10 }
 0x117   :  { %v526_v22 = vsel %vm392_vm2, %v525_v13, %v521_v20  ;;  %v680_v29 = vrot.slane %v307_v19, %v2920_v26 }
 0x118   :  { %v540_v27 = vsel %vm539_vm9, %v526_v22, %v538_v23  ;;  %v3121_v23 = vsub.s32 0, %v2897_v5 }
 0x119   :  { %2362 = vmatprep.mubr.msk.f32.mxu0 %vm736_vm10, %v540_v27  ;;  %v310_v28 = vpop.xlane.xlu1 %309  ;;  %v681_v58 = vsel %vm385_vm1, %v680_v29, %v676_v52  ;;  %v2417_v29 = vld [vmem:[#allocation5 + $0x60] ss:$8 sps:$4 sm:$0xff]  }
 0x11a   :  { %v316_v34 = vpop.xlane.xlu0 %315  ;;  %v685_v54 = vrot.slane %v310_v28, %v2944_v37  ;;  %v2429_v52 = vld [vmem:[#allocation5 + $0x40] ss:$8 sps:$4 sm:$0xff]  }
 0x11b   :  { %v694_v24 = vrot.slane %v316_v34, %v2906_v14  ;;  %v3128_v34 = vsub.s32 1, %v2897_v5 }
 0x11c   :  { %v686_v43 = vsel %vm392_vm2, %v685_v54, %v681_v58  ;;  %v2425_v54 = vld [vmem:[#allocation5 + $0x54] ss:$8 sps:$4 sm:$0xff]   ;;  %v2432_v58 = vld [vmem:[#allocation5 + $0x130] ss:$8 sps:$4 sm:$0xff]  }
 0x11d   :  { %v325_v32 = vpop.xlane.xlu1 %324  ;;  %v695_v56 = vsel %vm378_vm0, %v694_v24, %v690_v41  ;;  %v729_v3 = vsel %vm535_vm7, %v686_v43, %v728_v1  ;;  %v994_v24 = vsub.s32 4, %v2897_v5  ;;  %v1032_v41 = vsub.s32 6, %v2897_v5  ;;  %v2449_v1 = vld [vmem:[#allocation5 + $0x14] ss:$8 sps:$4 sm:$0xff]  }
 0x11e   :  { %v319_v42 = vpop.xlane.xlu0 %318  ;;  %v709_v59 = vrot.slane %v325_v32, %v2903_v10  ;;  %v956_v32 = vsub.s32 2, %v2897_v5  ;;  %v1051_v43 = vsub.s32 7, %v2897_v5 }
 0x11f   :  { %v699_v45 = vrot.slane %v319_v42, %v2920_v26  ;;  %v975_v42 = vsub.s32 3, %v2897_v5 }
 0x121   :  { %v322_v51 = vpop.xlane.xlu1 %321  ;;  %v700_v60 = vsel %vm385_vm1, %v699_v45, %v695_v56  ;;  %v2423_v45 = vld [vmem:[#allocation5 + $0x50] ss:$8 sps:$4 sm:$0xff]   ;;  %v2437_v56 = vld [vmem:[#allocation5 + $0x34] ss:$8 sps:$4 sm:$0xff]  }
 0x122   :  { %v328_v36 = vpop.xlane.xlu0 %327  ;;  %v704_v44 = vrot.slane %v322_v51, %v2944_v37  ;;  %v2422_v51 = vld [vmem:[#allocation5 + $0x154] ss:$8 sps:$4 sm:$0xff]  }
 0x123   :  { %v713_v53 = vrot.slane %v328_v36, %v2906_v14 }
 0x124   :  { %v705_v14 = vsel %vm392_vm2, %v704_v44, %v700_v60  ;;  %v2428_v44 = vld [vmem:[#allocation5 + $0x144] ss:$8 sps:$4 sm:$0xff]   ;;  %v2438_v60 = vld [vmem:[#allocation5 + $0x120] ss:$8 sps:$4 sm:$0xff]  }
 0x125   :  { %v334_v57 = vpop.xlane.xlu1 %333  ;;  %v714_v2 = vsel %vm378_vm0, %v713_v53, %v709_v59  ;;  %v730_v7 = vsel %vm537_vm8, %v705_v14, %v729_v3  ;;  %v2440_v59 = vld [vmem:[#allocation5 + $0x124] ss:$8 sps:$4 sm:$0xff]   ;;  %v2446_v14 = vld [vmem:[#allocation5 + $0x114] ss:$8 sps:$4 sm:$0xff]  }
 0x126   :  { %v331_v61 = vpop.xlane.xlu0 %330  ;;  %v723_v62 = vrot.slane %v334_v57, %v2944_v37  ;;  %v2435_v57 = vld [vmem:[#allocation5 + $0x30] ss:$8 sps:$4 sm:$0xff]   ;;  %v2452_v3 = vld [vmem:[#allocation5 + $0x104] ss:$8 sps:$4 sm:$0xff]  }
 0x127   :  { %v718_v0 = vrot.slane %v331_v61, %v2920_v26  ;;  %v820_v26 = vld [vmem:[%s3709_s2 + $0x10] sm:$0xff]  ;;  %v2443_v61 = vld [vmem:[#allocation5 + $0x24] ss:$8 sps:$4 sm:$0xff]   ;;  %s2653_s2 = smov [#allocation7]  }
 0x128   :  { %2391 = vmatprep.subr.mxu1 %v820_v26  ;;  %s2248_s13 = sshll.u32 %s2653_s2, 4  ;;  %s2249_s13 = int_to_ptr.vmem [resolvable:$true] %s2248_s13 }
 0x129   :  { %v719_v10 = vsel %vm385_vm1, %v718_v0, %v714_v2  ;;  %2392 = vmatpush3.msra.mxu1 %v820_v26  ;;  %v2444_v0 = vld [vmem:[#allocation5 + $0x110] ss:$8 sps:$4 sm:$0xff]   ;;  %s2620_s14 = scalar_lea.vmem %s2249_s13, 8192  ;;  %p2625_p11 = scmp.lt.s32.totalorder %s2249_s13, %s2249_s13 }
 0x12a   :  { %v724_v6 = vsel %vm392_vm2, %v723_v62, %v719_v10  ;;  %2393 = vmatprep.subr.mxu1 %v819_v25  ;;  %v2441_v62 = vld [vmem:[#allocation5 + $0x20] ss:$8 sps:$4 sm:$0xff]   ;;  %v2447_v2 = vld [vmem:[#allocation5 + $0x10] ss:$8 sps:$4 sm:$0xff]   ;;  %p2621_p10 = scmp.ne.s32.totalorder %s2249_s13, %s2620_s14  ;;  %p2626_p12 = scmp.lt.s32.totalorder %s2620_s14, %s2620_s14 }
 0x12b   :  { %v731_v37 = vsel %vm539_vm9, %v724_v6, %v730_v7  ;;  %2394 = vmatpush3.msra.mxu1 %v819_v25  ;;  %v2450_v10 = vld [vmem:[#allocation5 + $0x100] ss:$8 sps:$4 sm:$0xff]   ;;  %v2455_v6 = vld [vmem:[#allocation5 + $0x4] ss:$8 sps:$4 sm:$0xff]   ;;  %v2456_v26 = vld [vmem:[#allocation5 + $0x1f0] ss:$8 sps:$4 sm:$0xff]  }
 0x12c   :  { %2363 = vmatmul.mubr.msk.f32.vlgmr.msra.gmra.mxu0 %vm736_vm10, %v731_v37  ;;  %2395 = vmatprep.subr.mxu1 %v818_v8  ;;  %v2453_v7 = vld [vmem:[#allocation5] ss:$8 sps:$4 sm:$0xff]   ;;  %v2458_v37 = vld [vmem:[#allocation5 + $0x1f4] ss:$8 sps:$4 sm:$0xff]   ;;  %p2627_p13 = por %p2626_p12, %p2625_p11 }
 0x12d   :  { %2396 = vmatpush3.msra.mxu1 %v818_v8  ;;  %1890 = vmatpush1.bf16.msra.mxu0 %v2411_v39  ;;  %v2461_v25 = vld [vmem:[#allocation5 + $0xf4] ss:$8 sps:$4 sm:$0xff]   ;;  %v2459_v8 = vld [vmem:[#allocation5 + $0xf0] ss:$8 sps:$4 sm:$0xff]   ;;  %v2489_v39 = vld [vmem:[#allocation5 + $0xa0] ss:$8 sps:$4 sm:$0xff]  }
 0x12e   :  { %1930 = vmatprep.subr.bf16.mxu1 %v2410_v4  ;;  %1891 = vmatprep.subr.bf16.mxu0 %v2419_v49  ;;  %v2488_v4 = vld [vmem:[#allocation5 + $0x1a4] ss:$8 sps:$4 sm:$0xff]   ;;  %v2495_v49 = vld [vmem:[#allocation5 + $0x90] ss:$8 sps:$4 sm:$0xff]   ;;  %p2628_p0 = pnand %p2627_p13, %p2621_p10 }
 0x131   :  { %1892 = vmatpush1.bf16.msra.mxu0 %v2417_v29  ;;  %v2500_v29 = vld [vmem:[#allocation5 + $0x184] ss:$8 sps:$4 sm:$0xff]  }
 0x132   :  { %1893 = vmatprep.subr.bf16.mxu0 %v2425_v54 }
 0x135   :  { %1894 = vmatpush1.bf16.msra.mxu0 %v2423_v45 }
 0x136   :  { %1895 = vmatprep.subr.bf16.mxu0 %v2431_v55  ;;  %v2517_v55 = vld [vmem:[#allocation2 + $0x18] sm:$0xff] }
 0x139   :  { %1896 = vmatpush1.bf16.msra.mxu0 %v2429_v52 }
 0x13a   :  { %1897 = vmatprep.subr.bf16.mxu0 %v2437_v56 }
 0x13d   :  { %1898 = vmatpush1.bf16.msra.mxu0 %v2435_v57 }
 0x13e   :  { %1899 = vmatprep.subr.bf16.mxu0 %v2443_v61  ;;  %v2521_v61 = vld [vmem:[#allocation2 + $0x58] sm:$0xff] }
 0x141   :  { %1900 = vmatpush1.bf16.msra.mxu0 %v2441_v62 }
 0x142   :  { %1901 = vmatprep.subr.bf16.mxu0 %v2449_v1 }
 0x145   :  { %1902 = vmatpush1.bf16.msra.mxu0 %v2447_v2  ;;  %v2523_v2 = vld [vmem:[#allocation2 + $0x28] sm:$0xff] }
 0x146   :  { %1903 = vmatprep.subr.bf16.mxu0 %v2455_v6 }
 0x149   :  { %1904 = vmatpush1.bf16.msra.mxu0 %v2453_v7  ;;  %v2524_v7 = vld [vmem:[#allocation2 + $0x40] sm:$0xff] }
 0x14a   :  { %1905 = vmatprep.subr.bf16.mxu0 %v2461_v25 }
 0x14d   :  { %1906 = vmatpush2.bf16.msra.mxu0 %v2459_v8 }
 0x1ec   :  { %v2364_v9 = vpop.f32.mrf.mxu0 }
 0x1ed   :  { %v817_v12 = vmax.f32 %v2364_v9, 0.0  ;;  %v2464_v9 = vld [vmem:[#allocation5 + $0x1e4] ss:$8 sps:$4 sm:$0xff]  }
 0x1ee   :  { %v807_v11 = vpop.f32.mrf.mxu0 }
 0x1ef   :  { %v816_v15 = vmax.f32 %v807_v11, 0.0  ;;  %v2462_v11 = vld [vmem:[#allocation5 + $0x1e0] ss:$8 sps:$4 sm:$0xff]  }
 0x1f1   :  { %2397 = vmatprep.mubr.f32.mxu1 %v816_v15  ;;  %v2467_v15 = vld [vmem:[#allocation5 + $0xe4] ss:$8 sps:$4 sm:$0xff]  }
 0x1f2   :  { %2398 = vmatmul.mubr.f32.vlgmr.msra.gmra.mxu1 %v817_v12  ;;  %v2465_v12 = vld [vmem:[#allocation5 + $0xe0] ss:$8 sps:$4 sm:$0xff]   ;;  %1907 = vmatprep.subr.bf16.mxu0 %v2467_v15 }
 0x1f3   :  { %1931 = vmatpush1.bf16.msra.mxu1 %v2408_v30  ;;  %1908 = vmatpush2.bf16.msra.mxu0 %v2465_v12  ;;  %v2486_v30 = vld [vmem:[#allocation5 + $0x1a0] ss:$8 sps:$4 sm:$0xff]  }
 0x1f4   :  { %1932 = vmatprep.subr.bf16.mxu1 %v2416_v16  ;;  %v2492_v16 = vld [vmem:[#allocation5 + $0x190] ss:$8 sps:$4 sm:$0xff]   ;;  %v2527_v12 = vld [vmem:[#allocation2 + $0x88] sm:$0xff] }
 0x1f7   :  { %1933 = vmatpush1.bf16.msra.mxu1 %v2414_v18  ;;  %v2497_v18 = vld [vmem:[#allocation5 + $0x94] ss:$8 sps:$4 sm:$0xff]  }
 0x1f8   :  { %1934 = vmatprep.subr.bf16.mxu1 %v2422_v51  ;;  %v2501_v51 = vld [vmem:[#allocation5 + $0x80] ss:$8 sps:$4 sm:$0xff]  }
 0x1fb   :  { %1935 = vmatpush1.bf16.msra.mxu1 %v2420_v38  ;;  %v2503_v38 = vld [vmem:[#allocation5 + $0x84] ss:$8 sps:$4 sm:$0xff]  }
 0x1fc   :  { %1936 = vmatprep.subr.bf16.mxu1 %v2428_v44  ;;  %v2516_v44 = vld [vmem:[#allocation2 + $0x10] sm:$0xff] }
 0x1ff   :  { %1937 = vmatpush1.bf16.msra.mxu1 %v2426_v47 }
 0x200   :  { %1938 = vmatprep.subr.bf16.mxu1 %v2434_v48 }
 0x203   :  { %1939 = vmatpush1.bf16.msra.mxu1 %v2432_v58  ;;  %v2519_v58 = vld [vmem:[#allocation2 + $0x8] sm:$0xff] }
 0x204   :  { %1940 = vmatprep.subr.bf16.mxu1 %v2440_v59  ;;  %v2520_v59 = vld [vmem:[#allocation2 + $0x50] sm:$0xff] }
 0x207   :  { %1941 = vmatpush1.bf16.msra.mxu1 %v2438_v60 }
 0x208   :  { %1942 = vmatprep.subr.bf16.mxu1 %v2446_v14 }
 0x20b   :  { %1943 = vmatpush1.bf16.msra.mxu1 %v2444_v0  ;;  %v2522_v0 = vld [vmem:[#allocation2 + $0x20] sm:$0xff] }
 0x20c   :  { %1944 = vmatprep.subr.bf16.mxu1 %v2452_v3 }
 0x20f   :  { %1945 = vmatpush1.bf16.msra.mxu1 %v2450_v10 }
 0x210   :  { %1946 = vmatprep.subr.bf16.mxu1 %v2458_v37 }
 0x213   :  { %1947 = vmatpush2.bf16.msra.mxu1 %v2456_v26  ;;  %v2525_v26 = vld [vmem:[#allocation2 + $0x48] sm:$0xff] }
 0x214   :  { %1948 = vmatprep.subr.bf16.mxu1 %v2464_v9 }
 0x217   :  { %1949 = vmatpush2.bf16.msra.mxu1 %v2462_v11  ;;  %v2526_v11 = vld [vmem:[#allocation2 + $0x80] sm:$0xff] }
 0x2b2   :  { %v2399_v13 = vpop.f32.mrf.mxu1 }
 0x2b4   :  { %v900_v17 = vpop.f32.mrf.mxu1 }
 0x2b5   :  { %v909_v19 = vadd.f32 %v2399_v13, %v900_v17  ;;  %v2470_v13 = vld [vmem:[#allocation5 + $0x1d4] ss:$8 sps:$4 sm:$0xff]   ;;  %v2468_v17 = vld [vmem:[#allocation5 + $0x1d0] ss:$8 sps:$4 sm:$0xff]  }
 0x2b6   :  { %1950 = vmatprep.subr.bf16.mxu1 %v2470_v13 }
 0x2b7   :  { %v2263_v20 = vmul.f32 -1.442695, %v909_v19  ;;  %v2473_v19 = vld [vmem:[#allocation5 + $0xd4] ss:$8 sps:$4 sm:$0xff]   ;;  %1951 = vmatpush2.bf16.msra.mxu1 %v2468_v17 }
 0x2b8   :  { %1909 = vmatprep.subr.bf16.mxu0 %v2473_v19  ;;  %v2528_v17 = vld [vmem:[#allocation2 + $0x90] sm:$0xff] }
 0x2b9   :  { %2504 = vpow2.f32 %v2263_v20  ;;  %v2471_v20 = vld [vmem:[#allocation5 + $0xd0] ss:$8 sps:$4 sm:$0xff]  }
 0x2ba   :  { %1910 = vmatpush2.bf16.msra.mxu0 %v2471_v20  ;;  %v2529_v20 = vld [vmem:[#allocation2 + $0x98] sm:$0xff] }
 0x2c6   :  { %v2505_v21 = vpop.eup %2504 }
 0x2c7   :  { %v913_v22 = vadd.f32 1.0, %v2505_v21  ;;  %v2476_v21 = vld [vmem:[#allocation5 + $0x1c4] ss:$8 sps:$4 sm:$0xff]  }
 0x2c8   :  { %1952 = vmatprep.subr.bf16.mxu1 %v2476_v21 }
 0x2c9   :  { %2506 = vrcp.f32 %v913_v22  ;;  %v2474_v22 = vld [vmem:[#allocation5 + $0x1c0] ss:$8 sps:$4 sm:$0xff]  }
 0x2ca   :  { %1953 = vmatpush2.bf16.msra.mxu1 %v2474_v22 }
 0x2d6   :  { %v3123_v27 = vpop.eup %2506 }
 0x2d7   :  { %v919_v28 = vrot.slane %v3123_v27, %v3121_v23  ;;  %v938_v33 = vrot.slane %v3123_v27, %v3128_v34  ;;  %v957_v35 = vrot.slane %v3123_v27, %v956_v32  ;;  %v976_v46 = vrot.slane %v3123_v27, %v975_v42  ;;  %v2482_v32 = vld [vmem:[#allocation5 + $0x1b4] ss:$8 sps:$4 sm:$0xff]   ;;  %v2483_v42 = vld [vmem:[#allocation5 + $0xb0] ss:$8 sps:$4 sm:$0xff]  }
 0x2d8   :  { %v995_v36 = vrot.slane %v3123_v27, %v994_v24  ;;  %v1014_v40 = vrot.slane %v3123_v27, %v1013_v50  ;;  %v1033_v53 = vrot.slane %v3123_v27, %v1032_v41  ;;  %v1052_v63 = vrot.slane %v3123_v27, %v1051_v43  ;;  %v2479_v27 = vld [vmem:[#allocation5 + $0xc4] ss:$8 sps:$4 sm:$0xff]   ;;  %1954 = vmatprep.subr.bf16.mxu1 %v2482_v32  ;;  %v2498_v24 = vld [vmem:[#allocation5 + $0x180] ss:$8 sps:$4 sm:$0xff]  }
 0x2d9   :  { %925 = vbcast.lane.b32.xlu1 %v919_v28, 264  ;;  %921 = vbcast.lane.b32.xlu0 %v919_v28, 256 }
 0x2da   :  { %1911 = vmatprep.subr.bf16.mxu0 %v2479_v27 }
 0x2dd   :  { %940 = vbcast.lane.b32.xlu1 %v938_v33, 256  ;;  %959 = vbcast.lane.b32.xlu0 %v957_v35, 256 }
 0x2e1   :  { %944 = vbcast.lane.b32.xlu1 %v938_v33, 264  ;;  %929 = vbcast.lane.b32.xlu0 %v919_v28, 272 }
 0x2e5   :  { %963 = vbcast.lane.b32.xlu1 %v957_v35, 264  ;;  %978 = vbcast.lane.b32.xlu0 %v976_v46, 256 }
 0x2e9   :  { %948 = vbcast.lane.b32.xlu1 %v938_v33, 272  ;;  %967 = vbcast.lane.b32.xlu0 %v957_v35, 272 }
 0x2ed   :  { %982 = vbcast.lane.b32.xlu1 %v976_v46, 264  ;;  %1001 = vbcast.lane.b32.xlu0 %v995_v36, 264 }
 0x2f1   :  { %997 = vbcast.lane.b32.xlu1 %v995_v36, 256  ;;  %952 = vbcast.lane.b32.xlu0 %v938_v33, 280  ;;  %v2480_v33 = vld [vmem:[#allocation5 + $0x1b0] ss:$8 sps:$4 sm:$0xff]  }
 0x2f2   :  { %1955 = vmatpush2.bf16.msra.mxu1 %v2480_v33 }
 0x2f3   :  { %1956 = vmatprep.subr.bf16.mxu1 %v2488_v4 }
 0x2f5   :  { %933 = vbcast.lane.b32.xlu1 %v919_v28, 280  ;;  %1016 = vbcast.lane.b32.xlu0 %v1014_v40, 256  ;;  %v2477_v28 = vld [vmem:[#allocation5 + $0xc0] ss:$8 sps:$4 sm:$0xff]  }
 0x2f6   :  { %1912 = vmatpush2.bf16.msra.mxu0 %v2477_v28  ;;  %1957 = vmatpush2.bf16.msra.mxu1 %v2486_v30  ;;  %v2531_v30 = vld [vmem:[#allocation2 + $0x68] sm:$0xff] }
 0x2f9   :  { %986 = vbcast.lane.b32.xlu1 %v976_v46, 272  ;;  %971 = vbcast.lane.b32.xlu0 %v957_v35, 280  ;;  %v2485_v35 = vld [vmem:[#allocation5 + $0xb4] ss:$8 sps:$4 sm:$0xff]  }
 0x2fa   :  { %1913 = vmatprep.subr.bf16.mxu0 %v2485_v35 }
 0x2fb   :  { %1914 = vmatpush2.bf16.msra.mxu0 %v2483_v42  ;;  %v2530_v42 = vld [vmem:[#allocation2 + $0x60] sm:$0xff] }
 0x2fc   :  { %1915 = vmatprep.subr.bf16.mxu0 %v2491_v31 }
 0x2fd   :  { %1020 = vbcast.lane.b32.xlu1 %v1014_v40, 264  ;;  %1035 = vbcast.lane.b32.xlu0 %v1033_v53, 256 }
 0x2ff   :  { %1916 = vmatpush2.bf16.msra.mxu0 %v2489_v39 }
 0x300   :  { %1917 = vmatprep.subr.bf16.mxu0 %v2497_v18 }
 0x301   :  { %1005 = vbcast.lane.b32.xlu1 %v995_v36, 272  ;;  %990 = vbcast.lane.b32.xlu0 %v976_v46, 280  ;;  %v2494_v46 = vld [vmem:[#allocation5 + $0x194] ss:$8 sps:$4 sm:$0xff]  }
 0x302   :  { %1958 = vmatprep.subr.bf16.mxu1 %v2494_v46 }
 0x303   :  { %1959 = vmatpush2.bf16.msra.mxu1 %v2492_v16  ;;  %1918 = vmatpush2.bf16.msra.mxu0 %v2495_v49  ;;  %v2532_v16 = vld [vmem:[#allocation2 + $0xa0] sm:$0xff]  ;;  %v2533_v49 = vld [vmem:[#allocation2 + $0xa8] sm:$0xff] }
 0x304   :  { %1960 = vmatprep.subr.bf16.mxu1 %v2500_v29  ;;  %1919 = vmatprep.subr.bf16.mxu0 %v2503_v38 }
 0x305   :  { %1039 = vbcast.lane.b32.xlu1 %v1033_v53, 264  ;;  %1054 = vbcast.lane.b32.xlu0 %v1052_v63, 256 }
 0x307   :  { %1961 = vmatpush2.bf16.msra.mxu1 %v2498_v24  ;;  %1920 = vmatpush2.bf16.msra.mxu0 %v2501_v51 }
 0x309   :  { %1024 = vbcast.lane.b32.xlu1 %v1014_v40, 272  ;;  %1009 = vbcast.lane.b32.xlu0 %v995_v36, 280 }
 0x30d   :  { %1058 = vbcast.lane.b32.xlu1 %v1052_v63, 264  ;;  %1028 = vbcast.lane.b32.xlu0 %v1014_v40, 280 }
 0x311   :  { %1043 = vbcast.lane.b32.xlu1 %v1033_v53, 272  ;;  %1047 = vbcast.lane.b32.xlu0 %v1033_v53, 280  ;;  %v2518_v53 = vld [vmem:[#allocation2] sm:$0xff] }
 0x315   :  { %1062 = vbcast.lane.b32.xlu1 %v1052_v63, 272 }
 0x319   :  { %1066 = vbcast.lane.b32.xlu1 %v1052_v63, 280 }
 0x34b   :  { %v926_v54 = vpop.permute.xlu1 %925  ;;  %v922_v45 = vpop.permute.xlu0 %921 }
 0x34c   :  { %v3144_v47 = vmul.f32 %v2516_v44, %v926_v54  ;;  %v3146_v52 = vmul.f32 %v2517_v55, %v926_v54  ;;  %v3148_v48 = vmul.f32 %v2518_v53, %v922_v45  ;;  %v3150_v56 = vmul.f32 %v2519_v58, %v922_v45  ;;  %v2534_v45 = vld [vmem:[#allocation2 + $0xc0] sm:$0xff]  ;;  %v2536_v55 = vld [vmem:[#allocation2 + $0xd0] sm:$0xff]  ;;  %v2537_v58 = vld [vmem:[#allocation2 + $0xd8] sm:$0xff] }
 0x34e   :  { %3764 = vst [vmem:[#allocation11_spill] sm:$0xff] %v3146_v52  ;;  %v1132_v63 = vadd.f32 %v3144_v47, %v3148_v48  ;;  %v1141_v14 = vadd.f32 %v3146_v52, %v3150_v56  ;;  %v1293_v10 = vmax.f32 %v3148_v48, %v3144_v47  ;;  %v1302_v6 = vmax.f32 %v3150_v56, %v3146_v52 }
 0x34f   :  { %v941_v36 = vpop.permute.xlu1 %940  ;;  %v960_v50 = vpop.permute.xlu0 %959 }
 0x350   :  { %v3168_v37 = vmul.f32 %v2524_v7, %v941_v36  ;;  %v3170_v25 = vmul.f32 %v2525_v26, %v941_v36  ;;  %v3172_v15 = vmul.f32 %v2526_v11, %v960_v50  ;;  %v3174_v13 = vmul.f32 %v2527_v12, %v960_v50  ;;  %v2535_v50 = vld [vmem:[#allocation2 + $0xc8] sm:$0xff] }
 0x351   :  { %v2541_v12 = vld [vmem:[#allocation2 + $0x108] sm:$0xff] }
 0x352   :  { %3769 = vst [vmem:[#allocation16_spill] sm:$0xff] %v3168_v37  ;;  %3770 = vst [vmem:[#allocation17_spill] sm:$0xff] %v3170_v25 }
 0x353   :  { %v945_v40 = vpop.permute.xlu1 %944  ;;  %v930_v41 = vpop.permute.xlu0 %929  ;;  %3771 = vst [vmem:[#allocation18_spill] sm:$0xff] %v3172_v15  ;;  %3772 = vst [vmem:[#allocation19_spill] sm:$0xff] %v3174_v13 }
 0x354   :  { %v3152_v60 = vmul.f32 %v2520_v59, %v945_v40  ;;  %v3154_v62 = vmul.f32 %v2521_v61, %v945_v40  ;;  %v3160_v1 = vmul.f32 %v2522_v0, %v930_v41  ;;  %v3162_v3 = vmul.f32 %v2523_v2, %v930_v41  ;;  %v2538_v2 = vld [vmem:[#allocation2 + $0x110] sm:$0xff] }
 0x356   :  { %3765 = vst [vmem:[#allocation12_spill] sm:$0xff] %v3152_v60  ;;  %3766 = vst [vmem:[#allocation13_spill] sm:$0xff] %v3154_v62  ;;  %v1150_v22 = vadd.f32 %v3152_v60, %v3168_v37  ;;  %v1159_v27 = vadd.f32 %v3154_v62, %v3170_v25  ;;  %v1311_v28 = vmax.f32 %v3168_v37, %v3152_v60 }
 0x357   :  { %v964_v57 = vpop.permute.xlu1 %963  ;;  %v979_v43 = vpop.permute.xlu0 %978  ;;  %3767 = vst [vmem:[#allocation14_spill] sm:$0xff] %v3160_v1  ;;  %3768 = vst [vmem:[#allocation15_spill] sm:$0xff] %v3162_v3  ;;  %v1320_v32 = vmax.f32 %v3170_v25, %v3154_v62  ;;  %v3189_v33 = vadd.f32 %v1132_v63, %v3160_v1  ;;  %v3192_v35 = vadd.f32 %v1141_v14, %v3162_v3 }
 0x358   :  { %v3176_v19 = vmul.f32 %v2528_v17, %v964_v57  ;;  %v3178_v21 = vmul.f32 %v2529_v20, %v964_v57  ;;  %v3199_v39 = vmax.f32 %v1293_v10, %v3160_v1  ;;  %v3202_v46 = vmax.f32 %v1302_v6, %v3162_v3  ;;  %v2539_v6 = vld [vmem:[#allocation2 + $0x118] sm:$0xff]  ;;  %v2542_v20 = vld [vmem:[#allocation2 + $0x70] sm:$0xff] }
 0x359   :  { %v3212_v36 = vmul.f32 %v2534_v45, %v979_v43  ;;  %v3214_v40 = vmul.f32 %v2535_v50, %v979_v43 }
 0x35a   :  { %3773 = vst [vmem:[#allocation20_spill] sm:$0xff] %v3176_v19  ;;  %3774 = vst [vmem:[#allocation21_spill] sm:$0xff] %v3178_v21  ;;  %v1168_v38 = vadd.f32 %v3176_v19, %v3172_v15  ;;  %v1177_v54 = vadd.f32 %v3178_v21, %v3174_v13  ;;  %v1329_v41 = vmax.f32 %v3172_v15, %v3176_v19 }
 0x35b   :  { %v949_v8 = vpop.permute.xlu1 %948  ;;  %v968_v9 = vpop.permute.xlu0 %967  ;;  %3779 = vst [vmem:[#allocation26_spill] sm:$0xff] %v3212_v36  ;;  %3780 = vst [vmem:[#allocation27_spill] sm:$0xff] %v3214_v40  ;;  %v1338_v44 = vmax.f32 %v3174_v13, %v3178_v21 }
 0x35c   :  { %v3194_v4 = vmul.f32 %v2530_v42, %v949_v8  ;;  %v3196_v31 = vmul.f32 %v2531_v30, %v949_v8  ;;  %v3204_v18 = vmul.f32 %v2532_v16, %v968_v9  ;;  %v3206_v29 = vmul.f32 %v2533_v49, %v968_v9  ;;  %v2540_v9 = vld [vmem:[#allocation2 + $0x100] sm:$0xff] }
 0x35e   :  { %3775 = vst [vmem:[#allocation22_spill] sm:$0xff] %v3194_v4  ;;  %3776 = vst [vmem:[#allocation23_spill] sm:$0xff] %v3196_v31  ;;  %v1151_v59 = vadd.f32 %v1150_v22, %v3194_v4  ;;  %v1160_v61 = vadd.f32 %v1159_v27, %v3196_v31  ;;  %v1312_v63 = vmax.f32 %v1311_v28, %v3194_v4  ;;  %v2543_v27 = vld [vmem:[#allocation2 + $0x78] sm:$0xff] }
 0x35f   :  { %3777 = vst [vmem:[#allocation24_spill] sm:$0xff] %v3204_v18  ;;  %3778 = vst [vmem:[#allocation25_spill] sm:$0xff] %v3206_v29  ;;  %v983_v24 = vpop.permute.xlu1 %982  ;;  %v1002_v51 = vpop.permute.xlu0 %1001  ;;  %v1321_v43 = vmax.f32 %v1320_v32, %v3196_v31  ;;  %v3229_v14 = vadd.f32 %v1168_v38, %v3204_v18  ;;  %v3232_v0 = vadd.f32 %v1177_v54, %v3206_v29 }
 0x360   :  { %v3220_v53 = vmul.f32 %v2536_v55, %v983_v24  ;;  %v3222_v57 = vmul.f32 %v2537_v58, %v983_v24  ;;  %v3234_v10 = vmul.f32 %v2538_v2, %v1002_v51  ;;  %v3236_v7 = vmul.f32 %v2539_v6, %v1002_v51  ;;  %v2544_v2 = vld [vmem:[#allocation2 + $0x30] sm:$0xff] }
 0x361   :  { %v3247_v32 = vmax.f32 %v1329_v41, %v3204_v18  ;;  %v3250_v42 = vmax.f32 %v1338_v44, %v3206_v29 }
 0x362   :  { %3781 = vst [vmem:[#allocation28_spill] sm:$0xff] %v3220_v53  ;;  %3782 = vst [vmem:[#allocation29_spill] sm:$0xff] %v3222_v57  ;;  %v3254_v30 = vadd.f32 %v3220_v53, %v3212_v36  ;;  %v3258_v16 = vadd.f32 %v3222_v57, %v3214_v40 }
 0x363   :  { %3783 = vst [vmem:[#allocation30_spill] sm:$0xff] %v3234_v10  ;;  %3784 = vst [vmem:[#allocation31_spill] sm:$0xff] %v3236_v7  ;;  %v998_v26 = vpop.permute.xlu1 %997  ;;  %v953_v8 = vpop.permute.xlu0 %952 }
 0x364   :  { %v3238_v11 = vmul.f32 %v2540_v9, %v998_v26  ;;  %v3240_v17 = vmul.f32 %v2541_v12, %v998_v26  ;;  %v3242_v22 = vmul.f32 %v2542_v20, %v953_v8  ;;  %v3244_v28 = vmul.f32 %v2543_v27, %v953_v8  ;;  %v2545_v26 = vld [vmem:[#allocation2 + $0x38] sm:$0xff] }
 0x366   :  { %3785 = vst [vmem:[#allocation32_spill] sm:$0xff] %v3238_v11  ;;  %3786 = vst [vmem:[#allocation33_spill] sm:$0xff] %v3240_v17  ;;  %v3266_v51 = vadd.f32 %v3234_v10, %v3238_v11  ;;  %v3270_v38 = vadd.f32 %v3236_v7, %v3240_v17  ;;  %v1152_v54 = vadd.f32 %v1151_v59, %v3242_v22 }
 0x367   :  { %3787 = vst [vmem:[#allocation34_spill] sm:$0xff] %v3242_v22  ;;  %3788 = vst [vmem:[#allocation35_spill] sm:$0xff] %v3244_v28  ;;  %v1161_v45 = vadd.f32 %v1160_v61, %v3244_v28  ;;  %v1313_v50 = vmax.f32 %v1312_v63, %v3242_v22  ;;  %v1322_v41 = vmax.f32 %v1321_v43, %v3244_v28  ;;  %v934_v44 = vpop.permute.xlu1 %933  ;;  %v1017_v63 = vpop.permute.xlu0 %1016 }
 0x368   :  { %v3280_v6 = vmul.f32 %v2544_v2, %v934_v44  ;;  %v3282_v8 = vmul.f32 %v2545_v26, %v934_v44  ;;  %v1153_v59 = vrot.slane %v1152_v54, 4 }
 0x369   :  { %v1162_v9 = vrot.slane %v1161_v45, 4  ;;  %v1314_v61 = vrot.slane %v1313_v50, 4  ;;  %v1323_v12 = vrot.slane %v1322_v41, 4 }
 0x36a   :  { %3789 = vst [vmem:[#allocation36_spill] sm:$0xff] %v3280_v6  ;;  %3790 = vst [vmem:[#allocation37_spill] sm:$0xff] %v3282_v8  ;;  %v1134_v43 = vadd.f32 %v3189_v33, %v3280_v6  ;;  %v1143_v20 = vadd.f32 %v3192_v35, %v3282_v8  ;;  %v1295_v27 = vmax.f32 %v3199_v39, %v3280_v6 }
 0x36b   :  { %v1304_v2 = vmax.f32 %v3202_v46, %v3282_v8  ;;  %v1154_v58 = vadd.f32 %v1153_v59, %v1152_v54  ;;  %v1163_v44 = vadd.f32 %v1162_v9, %v1161_v45  ;;  %v1315_v26 = vmax.f32 %v1313_v50, %v1314_v61  ;;  %v987_v39 = vpop.permute.xlu1 %986  ;;  %v972_v45 = vpop.permute.xlu0 %971 }
 0x36c   :  { %v1324_v55 = vmax.f32 %v1322_v41, %v1323_v12  ;;  %v1135_v24 = vrot.slane %v1134_v43, 4  ;;  %v1144_v49 = vrot.slane %v1143_v20, 4  ;;  %v1296_v29 = vrot.slane %v1295_v27, 4 }
 0x36d   :  { %v1305_v18 = vrot.slane %v1304_v2, 4  ;;  %v1155_v21 = vrot.slane %v1154_v58, 2  ;;  %v1164_v19 = vrot.slane %v1163_v44, 2  ;;  %v1316_v33 = vrot.slane %v1315_v26, 2 }
 0x36e   :  { %v1325_v13 = vrot.slane %v1324_v55, 2  ;;  %v1136_v15 = vadd.f32 %v1135_v24, %v1134_v43  ;;  %v1145_v35 = vadd.f32 %v1144_v49, %v1143_v20  ;;  %v1297_v28 = vmax.f32 %v1295_v27, %v1296_v29  ;;  %v2546_v43 = vld [vmem:[#allocation2 + $0x140] sm:$0xff] }
 0x36f   :  { %v1306_v22 = vmax.f32 %v1304_v2, %v1305_v18  ;;  %v1156_v31 = vadd.f32 %v1155_v21, %v1154_v58  ;;  %v1165_v4 = vadd.f32 %v1164_v19, %v1163_v44  ;;  %v1317_v46 = vmax.f32 %v1315_v26, %v1316_v33  ;;  %v2547_v19 = vld [vmem:[#allocation2 + $0x148] sm:$0xff]  ;;  %v1021_v2 = vpop.permute.xlu1 %1020  ;;  %v2548_v33 = vld [vmem:[#allocation2 + $0xe0] sm:$0xff] }
 0x370   :  { %v1326_v54 = vmax.f32 %v1324_v55, %v1325_v13  ;;  %v1137_v50 = vrot.slane %v1136_v15, 2  ;;  %v1146_v41 = vrot.slane %v1145_v35, 2  ;;  %v1298_v59 = vrot.slane %v1297_v28, 2 }
 0x371   :  { %v1307_v9 = vrot.slane %v1306_v22, 2  ;;  %v1157_v61 = vrot.slane %v1156_v31, 1  ;;  %v1166_v12 = vrot.slane %v1165_v4, 1  ;;  %v1318_v62 = vrot.slane %v1317_v46, 1 }
 0x372   :  { %v1327_v60 = vrot.slane %v1326_v54, 1  ;;  %v1138_v25 = vadd.f32 %v1137_v50, %v1136_v15  ;;  %v1147_v37 = vadd.f32 %v1146_v41, %v1145_v35  ;;  %v1299_v24 = vmax.f32 %v1297_v28, %v1298_v59  ;;  %v2549_v28 = vld [vmem:[#allocation2 + $0xe8] sm:$0xff] }
 0x373   :  { %v1308_v49 = vmax.f32 %v1306_v22, %v1307_v9  ;;  %v1158_v29 = vadd.f32 %v1157_v61, %v1156_v31  ;;  %v1167_v18 = vadd.f32 %v1166_v12, %v1165_v4  ;;  %v3292_v21 = vmul.f32 %v2546_v43, %v1017_v63  ;;  %v1036_v4 = vpop.permute.xlu0 %1035  ;;  %v2550_v61 = vld [vmem:[#allocation2 + $0xb0] sm:$0xff] }
 0x374   :  { %v3294_v13 = vmul.f32 %v2547_v19, %v1017_v63  ;;  %v1139_v55 = vrot.slane %v1138_v25, 1  ;;  %v1148_v58 = vrot.slane %v1147_v37, 1  ;;  %v1300_v20 = vrot.slane %v1299_v24, 1 }
 0x375   :  { %3791 = vst [vmem:[#allocation38_spill] sm:$0xff] %v3292_v21  ;;  %v1309_v27 = vrot.slane %v1308_v49, 1  ;;  %v1319_v44 = vmax.f32 %v1317_v46, %v1318_v62  ;;  %v1328_v26 = vmax.f32 %v1326_v54, %v1327_v60  ;;  %v3296_v15 = vmul.f32 %v2548_v33, %v987_v39 }
 0x376   :  { %3792 = vst [vmem:[#allocation39_spill] sm:$0xff] %v3294_v13  ;;  %v3298_v22 = vmul.f32 %v2549_v28, %v987_v39  ;;  %v1140_v31 = vadd.f32 %v1139_v55, %v1138_v25  ;;  %v1149_v35 = vadd.f32 %v1148_v58, %v1147_v37  ;;  %v1301_v50 = vmax.f32 %v1299_v24, %v1300_v20  ;;  %v2551_v24 = vld [vmem:[#allocation2 + $0xb8] sm:$0xff] }
 0x377   :  { %3793 = vst [vmem:[#allocation40_spill] sm:$0xff] %v3296_v15  ;;  %v1310_v41 = vmax.f32 %v1308_v49, %v1309_v27  ;;  %v1279_v63 = vmul.f32 0.03125, %v1158_v29  ;;  %v1280_v59 = vmul.f32 0.03125, %v1167_v18  ;;  %v1187_v9 = vadd.f32 %v3254_v30, %v3296_v15  ;;  %v2552_v49 = vld [vmem:[#allocation2 + $0x150] sm:$0xff]  ;;  %v2553_v29 = vld [vmem:[#allocation2 + $0x158] sm:$0xff]  ;;  %v991_v28 = vpop.permute.xlu0 %990 }
 0x378   :  { %3794 = vst [vmem:[#allocation41_spill] sm:$0xff] %v3298_v22  ;;  %v1196_v62 = vadd.f32 %v3258_v16, %v3298_v22  ;;  %v1277_v60 = vmul.f32 0.03125, %v1140_v31  ;;  %v1278_v46 = vmul.f32 0.03125, %v1149_v35  ;;  %v3795_v39 = vmax.f32 %v3212_v36, %v3220_v53  ;;  %v2554_v31 = vld [vmem:[#allocation2 + $0x180] sm:$0xff]  ;;  %v2555_v35 = vld [vmem:[#allocation2 + $0x188] sm:$0xff] }
 0x379   :  { %v3796_v37 = vmax.f32 %v3214_v40, %v3222_v57  ;;  %v3312_v12 = vmul.f32 %v2550_v61, %v972_v45  ;;  %v3314_v30 = vmul.f32 %v2551_v24, %v972_v45  ;;  %v3316_v16 = vmul.f32 %v2552_v49, %v1021_v2  ;;  %v1006_v45 = vpop.permute.xlu1 %1005  ;;  %v2559_v61 = vld [vmem:[#allocation2 + $0xf8] sm:$0xff] }
 0x37a   :  { %v1348_v54 = vmax.f32 %v3795_v39, %v3296_v15  ;;  %v3318_v18 = vmul.f32 %v2553_v29, %v1021_v2  ;;  %v3321_v43 = vsel %vm527_vm3, %v1279_v63, %v1277_v60  ;;  %v3324_v19 = vsel %vm527_vm3, %v1280_v59, %v1278_v46  ;;  %v2557_v60 = vld [vmem:[#allocation2 + $0x128] sm:$0xff]  ;;  %v2558_v39 = vld [vmem:[#allocation2 + $0xf0] sm:$0xff] }
 0x37b   :  { %v1357_v25 = vmax.f32 %v3796_v37, %v3298_v22  ;;  %3797 = vst [vmem:[#allocation42_spill] sm:$0xff] %v3312_v12  ;;  %3798 = vst [vmem:[#allocation43_spill] sm:$0xff] %v3314_v30  ;;  %v3327_v55 = vsel %vm527_vm3, %v1319_v44, %v1301_v50  ;;  %v3330_v58 = vsel %vm527_vm3, %v1328_v26, %v1310_v41  ;;  %v1055_v8 = vpop.permute.xlu0 %1054 }
 0x37c   :  { %3799 = vst [vmem:[#allocation44_spill] sm:$0xff] %v3316_v16  ;;  %3800 = vst [vmem:[#allocation45_spill] sm:$0xff] %v3318_v18  ;;  %v1170_v20 = vadd.f32 %v3229_v14, %v3312_v12  ;;  %v1179_v27 = vadd.f32 %v3232_v0, %v3314_v30  ;;  %v1331_v2 = vmax.f32 %v3247_v32, %v3312_v12 }
 0x37d   :  { %v1340_v33 = vmax.f32 %v3250_v42, %v3314_v30  ;;  %v3342_v44 = vadd.f32 %v3316_v16, %v3292_v21  ;;  %v3346_v26 = vadd.f32 %v3318_v18, %v3294_v13  ;;  %v3348_v14 = vmul.f32 %v2554_v31, %v1036_v4  ;;  %v2556_v42 = vld [vmem:[#allocation2 + $0x120] sm:$0xff] }
 0x37e   :  { %v3350_v0 = vmul.f32 %v2555_v35, %v1036_v4  ;;  %v1171_v50 = vrot.slane %v1170_v20, 4  ;;  %v1180_v32 = vrot.slane %v1179_v27, 4  ;;  %v1332_v41 = vrot.slane %v1331_v2, 4 }
 0x37f   :  { %v1341_v63 = vrot.slane %v1340_v33, 4  ;;  %v3352_v59 = vmul.f32 %v2556_v42, %v1006_v45  ;;  %v3354_v46 = vmul.f32 %v2557_v60, %v1006_v45  ;;  %v3356_v37 = vmul.f32 %v2558_v39, %v991_v28 }
 0x380   :  { %v3358_v24 = vmul.f32 %v2559_v61, %v991_v28  ;;  %v1172_v49 = vadd.f32 %v1171_v50, %v1170_v20  ;;  %v1181_v29 = vadd.f32 %v1180_v32, %v1179_v27  ;;  %v1333_v4 = vmax.f32 %v1331_v2, %v1332_v41  ;;  %v1040_v28 = vpop.permute.xlu1 %1039 }
 0x381   :  { %3801 = vst [vmem:[#allocation46_spill] sm:$0xff] %v3352_v59  ;;  %3802 = vst [vmem:[#allocation47_spill] sm:$0xff] %v3354_v46  ;;  %v1342_v31 = vmax.f32 %v1340_v33, %v1341_v63  ;;  %v3366_v45 = vadd.f32 %v3266_v51, %v3352_v59  ;;  %v3370_v60 = vadd.f32 %v3270_v38, %v3354_v46 }
 0x382   :  { %3803 = vst [vmem:[#allocation48_spill] sm:$0xff] %v3356_v37  ;;  %3804 = vst [vmem:[#allocation49_spill] sm:$0xff] %v3358_v24  ;;  %v1173_v39 = vrot.slane %v1172_v49, 2  ;;  %v1182_v20 = vrot.slane %v1181_v29, 2  ;;  %v1334_v27 = vrot.slane %v1333_v4, 2  ;;  %v1188_v33 = vadd.f32 %v1187_v9, %v3356_v37 }
 0x383   :  { %v1343_v2 = vrot.slane %v1342_v31, 2  ;;  %v1197_v50 = vadd.f32 %v1196_v62, %v3358_v24  ;;  %v1349_v32 = vmax.f32 %v1348_v54, %v3356_v37  ;;  %v1358_v41 = vmax.f32 %v1357_v25, %v3358_v24 }
 0x384   :  { %v1174_v63 = vadd.f32 %v1173_v39, %v1172_v49  ;;  %v1183_v51 = vadd.f32 %v1182_v20, %v1181_v29  ;;  %v1335_v61 = vmax.f32 %v1333_v4, %v1334_v27  ;;  %v1189_v35 = vrot.slane %v1188_v33, 4  ;;  %v1025_v54 = vpop.permute.xlu1 %1024 }
 0x385   :  { %v1344_v42 = vmax.f32 %v1342_v31, %v1343_v2  ;;  %v1198_v38 = vrot.slane %v1197_v50, 4  ;;  %v1350_v22 = vrot.slane %v1349_v32, 4  ;;  %v1359_v15 = vrot.slane %v1358_v41, 4 }
 0x386   :  { %v1175_v57 = vrot.slane %v1174_v63, 1  ;;  %v1184_v53 = vrot.slane %v1183_v51, 1  ;;  %v1336_v40 = vrot.slane %v1335_v61, 1  ;;  %v1190_v30 = vadd.f32 %v1189_v35, %v1188_v33 }
 0x387   :  { %v1345_v36 = vrot.slane %v1344_v42, 1  ;;  %v1199_v9 = vadd.f32 %v1198_v38, %v1197_v50  ;;  %v1351_v12 = vmax.f32 %v1349_v32, %v1350_v22  ;;  %v1360_v62 = vmax.f32 %v1358_v41, %v1359_v15  ;;  %v1010_v38 = vpop.permute.xlu0 %1009 }
 0x388   :  { %v1176_v37 = vadd.f32 %v1175_v57, %v1174_v63  ;;  %v1185_v25 = vadd.f32 %v1184_v53, %v1183_v51  ;;  %v1337_v49 = vmax.f32 %v1335_v61, %v1336_v40  ;;  %v3805_v29 = vmax.f32 %v3238_v11, %v3234_v10  ;;  %v2560_v57 = vld [vmem:[#allocation2 + $0x190] sm:$0xff] }
 0x389   :  { %v1191_v31 = vrot.slane %v1190_v30, 2  ;;  %v1200_v39 = vrot.slane %v1199_v9, 2  ;;  %v1352_v20 = vrot.slane %v1351_v12, 2  ;;  %v1361_v27 = vrot.slane %v1360_v62, 2 }
 0x38a   :  { %v1366_v4 = vmax.f32 %v3805_v29, %v3352_v59  ;;  %v1281_v2 = vmul.f32 0.03125, %v1176_v37  ;;  %v3380_v24 = vmax.f32 %v1344_v42, %v1345_v36  ;;  %v3806_v15 = vmax.f32 %v3240_v17, %v3236_v7  ;;  %v2561_v37 = vld [vmem:[#allocation2 + $0x198] sm:$0xff] }
 0x38b   :  { %v3386_v53 = vmul.f32 %v2560_v57, %v1040_v28  ;;  %v1192_v40 = vadd.f32 %v1191_v31, %v1190_v30  ;;  %v1201_v35 = vadd.f32 %v1200_v39, %v1199_v9  ;;  %v1353_v33 = vmax.f32 %v1351_v12, %v1352_v20  ;;  %v1059_v12 = vpop.permute.xlu1 %1058  ;;  %v2563_v31 = vld [vmem:[#allocation2 + $0x1c8] sm:$0xff]  ;;  %v2564_v20 = vld [vmem:[#allocation2 + $0x160] sm:$0xff]  ;;  %v2566_v57 = vld [vmem:[#allocation2 + $0x130] sm:$0xff] }
 0x38c   :  { %v1375_v22 = vmax.f32 %v3806_v15, %v3354_v46  ;;  %v1362_v50 = vmax.f32 %v1360_v62, %v1361_v27  ;;  %v3388_v32 = vmul.f32 0.03125, %v1185_v25  ;;  %v3392_v41 = vsel %vm529_vm4, %v1281_v2, %v3321_v43  ;;  %v2565_v2 = vld [vmem:[#allocation2 + $0x168] sm:$0xff] }
 0x38d   :  { %v3396_v36 = vsel %vm529_vm4, %v1337_v49, %v3327_v55  ;;  %v3398_v42 = vmul.f32 %v2561_v37, %v1040_v28  ;;  %v1193_v63 = vrot.slane %v1192_v40, 1  ;;  %v1202_v51 = vrot.slane %v1201_v35, 1  ;;  %v2562_v49 = vld [vmem:[#allocation2 + $0x1c0] sm:$0xff]  ;;  %v2567_v55 = vld [vmem:[#allocation2 + $0x138] sm:$0xff] }
 0x38e   :  { %v1354_v61 = vrot.slane %v1353_v33, 1  ;;  %v1363_v30 = vrot.slane %v1362_v50, 1  ;;  %v3402_v9 = vadd.f32 %v3386_v53, %v3348_v14  ;;  %v3412_v29 = vmul.f32 %v2562_v49, %v1055_v8 }
 0x38f   :  { %v3406_v43 = vadd.f32 %v3398_v42, %v3350_v0  ;;  %v1194_v62 = vadd.f32 %v1193_v63, %v1192_v40  ;;  %v1203_v25 = vadd.f32 %v1202_v51, %v1201_v35  ;;  %v3414_v39 = vmul.f32 %v2563_v31, %v1055_v8  ;;  %v2568_v63 = vld [vmem:[#allocation2 + $0x1d0] sm:$0xff]  ;;  %v2569_v8 = vld [vmem:[#allocation2 + $0x1d8] sm:$0xff] }
 0x390   :  { %3807 = vst [vmem:[#allocation50_spill] sm:$0xff] %v3412_v29  ;;  %v3416_v27 = vmul.f32 %v2564_v20, %v1025_v54  ;;  %v3418_v15 = vmul.f32 %v2565_v2, %v1025_v54  ;;  %v3420_v37 = vmul.f32 %v2566_v57, %v1010_v38  ;;  %v3422_v46 = vmul.f32 %v2567_v55, %v1010_v38  ;;  %v1044_v55 = vpop.permute.xlu1 %1043 }
 0x391   :  { %3808 = vst [vmem:[#allocation51_spill] sm:$0xff] %v3414_v39  ;;  %v3424_v40 = vmax.f32 %v1353_v33, %v1354_v61  ;;  %v3426_v35 = vmax.f32 %v1362_v50, %v1363_v30  ;;  %v3428_v51 = vmul.f32 %v2568_v63, %v1059_v12  ;;  %v3430_v49 = vmul.f32 %v2569_v8, %v1059_v12  ;;  %v1029_v12 = vpop.permute.xlu0 %1028  ;;  %v2570_v63 = vld [vmem:[#allocation2 + $0x170] sm:$0xff] }
 0x392   :  { %3809 = vst [vmem:[#allocation52_spill] sm:$0xff] %v3416_v27  ;;  %3810 = vst [vmem:[#allocation53_spill] sm:$0xff] %v3418_v15  ;;  %v3432_v31 = vmul.f32 0.03125, %v1194_v62  ;;  %v3434_v54 = vmul.f32 0.03125, %v1203_v25  ;;  %v1223_v20 = vadd.f32 %v3342_v44, %v3416_v27  ;;  %v1232_v38 = vadd.f32 %v3346_v26, %v3418_v15 }
 0x393   :  { %3811 = vst [vmem:[#allocation54_spill] sm:$0xff] %v3420_v37  ;;  %3812 = vst [vmem:[#allocation55_spill] sm:$0xff] %v3422_v46  ;;  %v1206_v33 = vadd.f32 %v3366_v45, %v3420_v37  ;;  %v1215_v50 = vadd.f32 %v3370_v60, %v3422_v46  ;;  %v1367_v61 = vmax.f32 %v1366_v4, %v3420_v37 }
 0x394   :  { %3813 = vst [vmem:[#allocation56_spill] sm:$0xff] %v3428_v51  ;;  %3814 = vst [vmem:[#allocation57_spill] sm:$0xff] %v3430_v49  ;;  %v1376_v30 = vmax.f32 %v1375_v22, %v3422_v46  ;;  %v3815_v62 = vmax.f32 %v3292_v21, %v3316_v16  ;;  %v3816_v26 = vmax.f32 %v3294_v13, %v3318_v18 }
 0x395   :  { %v3456_v45 = vadd.f32 %v3428_v51, %v3412_v29  ;;  %v3460_v60 = vadd.f32 %v3430_v49, %v3414_v39  ;;  %v1207_v4 = vrot.slane %v1206_v33, 4  ;;  %v1216_v22 = vrot.slane %v1215_v50, 4 }
 0x396   :  { %v1384_v44 = vmax.f32 %v3815_v62, %v3416_v27  ;;  %v1393_v25 = vmax.f32 %v3816_v26, %v3418_v15  ;;  %v1368_v2 = vrot.slane %v1367_v61, 4  ;;  %v1377_v57 = vrot.slane %v1376_v30, 4  ;;  %v2571_v62 = vld [vmem:[#allocation2 + $0x178] sm:$0xff]  ;;  %v2572_v27 = vld [vmem:[#allocation2 + $0x1a0] sm:$0xff]  ;;  %v2573_v15 = vld [vmem:[#allocation2 + $0x1a8] sm:$0xff] }
 0x397   :  { %v3462_v8 = vmul.f32 %v2570_v63, %v1029_v12  ;;  %v3464_v28 = vmul.f32 %v2571_v62, %v1029_v12  ;;  %v3466_v26 = vmul.f32 %v2572_v27, %v1044_v55  ;;  %v3468_v18 = vmul.f32 %v2573_v15, %v1044_v55 }
 0x398   :  { %v1208_v16 = vadd.f32 %v1207_v4, %v1206_v33  ;;  %v1217_v13 = vadd.f32 %v1216_v22, %v1215_v50  ;;  %v1369_v21 = vmax.f32 %v1367_v61, %v1368_v2  ;;  %v1378_v46 = vmax.f32 %v1376_v30, %v1377_v57 }
 0x399   :  { %3817 = vst [vmem:[#allocation58_spill] sm:$0xff] %v3462_v8  ;;  %3818 = vst [vmem:[#allocation59_spill] sm:$0xff] %v3464_v28  ;;  %v1224_v37 = vadd.f32 %v1223_v20, %v3462_v8  ;;  %v1233_v59 = vadd.f32 %v1232_v38, %v3464_v28  ;;  %v1385_v63 = vmax.f32 %v1384_v44, %v3462_v8 }
 0x39a   :  { %v1394_v7 = vmax.f32 %v1393_v25, %v3464_v28  ;;  %v1209_v12 = vrot.slane %v1208_v16, 2  ;;  %v1218_v62 = vrot.slane %v1217_v13, 2  ;;  %v1370_v10 = vrot.slane %v1369_v21, 2 }
 0x39b   :  { %v1379_v27 = vrot.slane %v1378_v46, 2  ;;  %v1225_v17 = vrot.slane %v1224_v37, 4  ;;  %v1234_v11 = vrot.slane %v1233_v59, 4  ;;  %v1386_v15 = vrot.slane %v1385_v63, 4 }
 0x39c   :  { %v1395_v55 = vrot.slane %v1394_v7, 4  ;;  %v1210_v33 = vadd.f32 %v1209_v12, %v1208_v16  ;;  %v1219_v50 = vadd.f32 %v1218_v62, %v1217_v13  ;;  %v1371_v61 = vmax.f32 %v1369_v21, %v1370_v10  ;;  %v1048_v13 = vpop.permute.xlu0 %1047  ;;  %v1063_v12 = vpop.permute.xlu1 %1062 }
 0x39d   :  { %v1380_v30 = vmax.f32 %v1378_v46, %v1379_v27  ;;  %v1226_v4 = vadd.f32 %v1225_v17, %v1224_v37  ;;  %v1235_v20 = vadd.f32 %v1234_v11, %v1233_v59  ;;  %v1387_v22 = vmax.f32 %v1385_v63, %v1386_v15 }
 0x39e   :  { %v1396_v38 = vmax.f32 %v1394_v7, %v1395_v55  ;;  %v1211_v2 = vrot.slane %v1210_v33, 1  ;;  %v1220_v44 = vrot.slane %v1219_v50, 1  ;;  %v1372_v57 = vrot.slane %v1371_v61, 1 }
 0x39f   :  { %v1381_v25 = vrot.slane %v1380_v30, 1  ;;  %v1227_v28 = vrot.slane %v1226_v4, 2  ;;  %v1236_v8 = vrot.slane %v1235_v20, 2  ;;  %v1388_v6 = vrot.slane %v1387_v22, 2 }
 0x3a0   :  { %v1397_v3 = vrot.slane %v1396_v38, 2  ;;  %v1212_v1 = vadd.f32 %v1211_v2, %v1210_v33  ;;  %v1221_v52 = vadd.f32 %v1220_v44, %v1219_v50  ;;  %v1419_v16 = vmax.f32 %v3412_v29, %v3428_v51  ;;  %v2574_v33 = vld [vmem:[#allocation2 + $0x1b0] sm:$0xff]  ;;  %v2575_v50 = vld [vmem:[#allocation2 + $0x1b8] sm:$0xff] }
 0x3a1   :  { %v1428_v10 = vmax.f32 %v3414_v39, %v3430_v49  ;;  %v1228_v17 = vadd.f32 %v1227_v28, %v1226_v4  ;;  %v1237_v11 = vadd.f32 %v1236_v8, %v1235_v20  ;;  %v1389_v21 = vmax.f32 %v1387_v22, %v1388_v6 }
 0x3a2   :  { %v1398_v7 = vmax.f32 %v1396_v38, %v1397_v3  ;;  %v3478_v59 = vmax.f32 %v1371_v61, %v1372_v57  ;;  %v3480_v46 = vmax.f32 %v1380_v30, %v1381_v25  ;;  %v1241_v37 = vadd.f32 %v3402_v9, %v3466_v26 }
 0x3a3   :  { %v1250_v63 = vadd.f32 %v3406_v43, %v3468_v18  ;;  %v1229_v62 = vrot.slane %v1228_v17, 1  ;;  %v1238_v27 = vrot.slane %v1237_v11, 1  ;;  %v1390_v15 = vrot.slane %v1389_v21, 1 }
 0x3a4   :  { %v1399_v55 = vrot.slane %v1398_v7, 1  ;;  %v3819_v3 = vmax.f32 %v3348_v14, %v3386_v53  ;;  %v3820_v28 = vmax.f32 %v3350_v0, %v3398_v42  ;;  %v3494_v9 = vmul.f32 %v2574_v33, %v1048_v13 }
 0x3a5   :  { %v3496_v43 = vmul.f32 %v2575_v50, %v1048_v13  ;;  %v3498_v61 = vmul.f32 0.03125, %v1212_v1  ;;  %v3500_v30 = vmul.f32 0.03125, %v1221_v52  ;;  %v1230_v4 = vadd.f32 %v1229_v62, %v1228_v17  ;;  %v2576_v13 = vld [vmem:[#allocation2 + $0x1e0] sm:$0xff]  ;;  %v2577_v1 = vld [vmem:[#allocation2 + $0x1e8] sm:$0xff]  ;;  %v2578_v50 = vld [vmem:[#allocation2 + $0x1f0] sm:$0xff] }
 0x3a6   :  { %v1402_v6 = vmax.f32 %v3819_v3, %v3466_v26  ;;  %v1411_v8 = vmax.f32 %v3820_v28, %v3468_v18  ;;  %v1239_v20 = vadd.f32 %v1238_v27, %v1237_v11  ;;  %v1242_v22 = vadd.f32 %v1241_v37, %v3494_v9  ;;  %v1067_v27 = vpop.permute.xlu1 %1066 }
 0x3a7   :  { %3821 = vst [vmem:[#allocation60_spill] sm:$0xff] %v3496_v43  ;;  %v1251_v38 = vadd.f32 %v1250_v63, %v3496_v43  ;;  %v3506_v57 = vmax.f32 %v1389_v21, %v1390_v15  ;;  %v3508_v25 = vmax.f32 %v1398_v7, %v1399_v55  ;;  %v3510_v3 = vmul.f32 %v2576_v13, %v1063_v12 }
 0x3a8   :  { %v1403_v2 = vmax.f32 %v1402_v6, %v3494_v9  ;;  %v1412_v44 = vmax.f32 %v1411_v8, %v3496_v43  ;;  %v3512_v52 = vmul.f32 %v2577_v1, %v1063_v12  ;;  %v1243_v17 = vrot.slane %v1242_v22, 4 }
 0x3a9   :  { %3822 = vst [vmem:[#allocation61_spill] sm:$0xff] %v3510_v3  ;;  %v1252_v11 = vrot.slane %v1251_v38, 4  ;;  %v3514_v63 = vmul.f32 0.03125, %v1230_v4  ;;  %v3516_v6 = vmul.f32 0.03125, %v1239_v20  ;;  %v1259_v21 = vadd.f32 %v3456_v45, %v3510_v3  ;;  %v2579_v4 = vld [vmem:[#allocation2 + $0x1f8] sm:$0xff] }
 0x3aa   :  { %3823 = vst [vmem:[#allocation62_spill] sm:$0xff] %v3512_v52  ;;  %v1404_v62 = vrot.slane %v1403_v2, 4  ;;  %v1413_v37 = vrot.slane %v1412_v44, 4  ;;  %v1268_v7 = vadd.f32 %v3460_v60, %v3512_v52  ;;  %v1244_v15 = vadd.f32 %v1243_v17, %v1242_v22 }
 0x3ab   :  { %v1253_v55 = vadd.f32 %v1252_v11, %v1251_v38  ;;  %v1420_v8 = vmax.f32 %v1419_v16, %v3510_v3  ;;  %v1429_v33 = vmax.f32 %v1428_v10, %v3512_v52  ;;  %v3524_v13 = vmul.f32 %v2578_v50, %v1067_v27 }
 0x3ac   :  { %v1405_v28 = vmax.f32 %v1403_v2, %v1404_v62  ;;  %v1414_v12 = vmax.f32 %v1412_v44, %v1413_v37  ;;  %v3526_v20 = vmul.f32 %v2579_v4, %v1067_v27  ;;  %v1245_v1 = vrot.slane %v1244_v15, 2 }
 0x3ad   :  { %v1254_v49 = vrot.slane %v1253_v55, 2  ;;  %v1260_v60 = vadd.f32 %v1259_v21, %v3524_v13  ;;  %v1421_v38 = vmax.f32 %v1420_v8, %v3524_v13 }
 0x3ae   :  { %v1406_v45 = vrot.slane %v1405_v28, 2  ;;  %v1415_v51 = vrot.slane %v1414_v12, 2  ;;  %v1269_v22 = vadd.f32 %v1268_v7, %v3526_v20  ;;  %v1430_v16 = vmax.f32 %v1429_v33, %v3526_v20 }
 0x3af   :  { %v1246_v2 = vadd.f32 %v1245_v1, %v1244_v15  ;;  %v1255_v10 = vadd.f32 %v1254_v49, %v1253_v55  ;;  %v1261_v11 = vrot.slane %v1260_v60, 4  ;;  %v1422_v37 = vrot.slane %v1421_v38, 4 }
 0x3b0   :  { %v1407_v44 = vmax.f32 %v1405_v28, %v1406_v45  ;;  %v1416_v17 = vmax.f32 %v1414_v12, %v1415_v51  ;;  %v1270_v62 = vrot.slane %v1269_v22, 4  ;;  %v1431_v27 = vrot.slane %v1430_v16, 4 }
 0x3b1   :  { %v1247_v50 = vrot.slane %v1246_v2, 1  ;;  %v1256_v4 = vrot.slane %v1255_v10, 1  ;;  %v1262_v39 = vadd.f32 %v1261_v11, %v1260_v60  ;;  %v1423_v29 = vmax.f32 %v1421_v38, %v1422_v37 }
 0x3b2   :  { %v1408_v52 = vrot.slane %v1407_v44, 1  ;;  %v1417_v3 = vrot.slane %v1416_v17, 1  ;;  %v1271_v21 = vadd.f32 %v1270_v62, %v1269_v22  ;;  %v1432_v7 = vmax.f32 %v1430_v16, %v1431_v27 }
 0x3b3   :  { %v1248_v43 = vadd.f32 %v1247_v50, %v1246_v2  ;;  %v1257_v8 = vadd.f32 %v1256_v4, %v1255_v10  ;;  %v1493_v49 = vsel %vm529_vm4, %v3380_v24, %v3330_v58  ;;  %v1487_v51 = vsel %vm531_vm5, %v3424_v40, %v3396_v36 }
 0x3b4   :  { %v1263_v15 = vrot.slane %v1262_v39, 2  ;;  %v1272_v55 = vrot.slane %v1271_v21, 2  ;;  %v1424_v28 = vrot.slane %v1423_v29, 2  ;;  %v1433_v12 = vrot.slane %v1432_v7, 2 }
 0x3b5   :  { %v1409_v33 = vmax.f32 %v1407_v44, %v1408_v52  ;;  %v1418_v1 = vmax.f32 %v1416_v17, %v1417_v3  ;;  %v1494_v45 = vsel %vm531_vm5, %v3426_v35, %v1493_v49  ;;  %v1488_v60 = vsel %vm533_vm6, %v3478_v59, %v1487_v51 }
 0x3b6   :  { %v1264_v22 = vadd.f32 %v1263_v15, %v1262_v39  ;;  %v1273_v38 = vadd.f32 %v1272_v55, %v1271_v21  ;;  %v1425_v16 = vmax.f32 %v1423_v29, %v1424_v28  ;;  %v1434_v58 = vmax.f32 %v1432_v7, %v1433_v12 }
 0x3b7   :  { %v1289_v24 = vmul.f32 0.03125, %v1248_v43  ;;  %v1495_v36 = vsel %vm533_vm6, %v3480_v46, %v1494_v45  ;;  %v1489_v40 = vsel %vm535_vm7, %v3506_v57, %v1488_v60  ;;  %v1290_v2 = vmul.f32 0.03125, %v1257_v8 }
 0x3b8   :  { %v1265_v52 = vrot.slane %v1264_v22, 1  ;;  %v1274_v3 = vrot.slane %v1273_v38, 1  ;;  %v1426_v10 = vrot.slane %v1425_v16, 1  ;;  %v1435_v44 = vrot.slane %v1434_v58, 1 }
 0x3b9   :  { %v1496_v35 = vsel %vm535_vm7, %v3508_v25, %v1495_v36  ;;  %v1490_v39 = vsel %vm537_vm8, %v1409_v33, %v1489_v40  ;;  %v1461_v29 = vsel %vm529_vm4, %v3388_v32, %v3324_v19  ;;  %v1455_v59 = vsel %vm531_vm5, %v3432_v31, %v3392_v41 }
 0x3ba   :  { %v1266_v46 = vadd.f32 %v1265_v52, %v1264_v22  ;;  %v1427_v43 = vmax.f32 %v1425_v16, %v1426_v10  ;;  %v1436_v57 = vmax.f32 %v1434_v58, %v1435_v44  ;;  %v1462_v17 = vsel %vm531_vm5, %v3434_v54, %v1461_v29 }
 0x3bb   :  { %v1497_v11 = vsel %vm537_vm8, %v1418_v1, %v1496_v35  ;;  %v1275_v62 = vadd.f32 %v1274_v3, %v1273_v38  ;;  %v1463_v25 = vsel %vm533_vm6, %v3500_v30, %v1462_v17  ;;  %v1456_v37 = vsel %vm533_vm6, %v3498_v61, %v1455_v59 }
 0x3bc   :  { %v1291_v19 = vmul.f32 0.03125, %v1266_v46  ;;  %v1498_v32 = vsel %vm539_vm9, %v1436_v57, %v1497_v11  ;;  %v1491_v41 = vsel %vm539_vm9, %v1427_v43, %v1490_v39  ;;  %v1457_v31 = vsel %vm535_vm7, %v3514_v63, %v1456_v37 }
 0x3bd   :  { %v1504_v27 = vpack.c.bf16 %v1498_v32, %v1498_v32  ;;  %v1503_v50 = vpack.c.bf16 %v1491_v41, %v1491_v41  ;;  %v1292_v54 = vmul.f32 0.03125, %v1275_v62  ;;  %v1464_v4 = vsel %vm535_vm7, %v3516_v6, %v1463_v25 }
 0x3be   :  { %v1465_v21 = vsel %vm537_vm8, %v1290_v2, %v1464_v4  ;;  %v1458_v30 = vsel %vm537_vm8, %v1289_v24, %v1457_v31  ;;  %v2652_v36 = vmov 1966171168  }
 0x3bf   :  { %1962 = vmatprep.mubr.bf16.mxu1 %v1504_v27  ;;  %v1466_v61 = vsel %vm539_vm9, %v1292_v54, %v1465_v21  ;;  %v1459_v7 = vsel %vm539_vm9, %v1291_v19, %v1458_v30  ;;  %v1988_v40 = vunpack.c.l.s4 %v2652_v36 }
 0x3c0   :  { %1963 = vmatmul.mubr.bf16.vlgmr.msra.gmra.mxu1 %v1503_v50  ;;  %v1502_v8 = vpack.c.bf16 %v1466_v61, %v1466_v61  ;;  %v1501_v49 = vpack.c.bf16 %v1459_v7, %v1459_v7 }
 0x3c1   :  { %v1989_v2 = vunpack.c.0.s8 %v1988_v40  ;;  %v3832_v40 = vld [vmem:[#allocation13_spill] sm:$0xff] }
 0x3c2   :  { %1921 = vmatprep.mubr.bf16.mxu0 %v1502_v8 }
 0x3c3   :  { %1922 = vmatmul.mubr.bf16.vlgmr.msra.gmra.mxu0 %v1501_v49  ;;  %v1992_v3 = vsub.s32 %v1989_v2, %v2897_v5  ;;  %v3833_v2 = vld [vmem:[#allocation22_spill] sm:$0xff] }
 0x480   :  { %v1964_v63 = vpop.f32.mrf.mxu1 }
 0x482   :  { %v1966_v51 = vpop.f32.mrf.mxu1 }
 0x483   :  { %v1923_v15 = vpop.f32.mrf.mxu0 }
 0x484   :  { %v1965_v55 = vadd.f32 %v1964_v63, %v1923_v15  ;;  %v1968_v28 = vpop.f32.mrf.mxu1 }
 0x485   :  { %v1925_v6 = vpop.f32.mrf.mxu0 }
 0x486   :  { %v2328_v12 = vmul.f32 -1.442695, %v1965_v55  ;;  %v1967_v33 = vadd.f32 %v1966_v51, %v1925_v6  ;;  %v1969_v1 = vpop.f32.mrf.mxu1  ;;  %v3824_v6 = vld [vmem:[#allocation11_spill] sm:$0xff] }
 0x487   :  { %v1927_v45 = vpop.f32.mrf.mxu0 }
 0x488   :  { %2508 = vpow2.f32 %v2328_v12  ;;  %v2329_v60 = vmul.f32 -1.442695, %v1967_v33  ;;  %v3825_v33 = vld [vmem:[#allocation14_spill] sm:$0xff]  ;;  %v3826_v45 = vld [vmem:[#allocation15_spill] sm:$0xff] }
 0x489   :  { %v1928_v22 = vpop.f32.mrf.mxu0 }
 0x48a   :  { %2510 = vpow2.f32 %v2329_v60  ;;  %v3827_v22 = vld [vmem:[#allocation36_spill] sm:$0xff] }
 0x495   :  { %v2509_v38 = vpop.eup %2508 }
 0x496   :  { %v1977_v16 = vadd.f32 1.0, %v2509_v38 }
 0x497   :  { %v2511_v58 = vpop.eup %2510 }
 0x498   :  { %v1978_v24 = vadd.f32 1.0, %v2511_v58  ;;  %2512 = vrcp.f32 %v1977_v16  ;;  %v3828_v16 = vld [vmem:[#allocation37_spill] sm:$0xff]  ;;  %v3829_v58 = vld [vmem:[#allocation16_spill] sm:$0xff] }
 0x49a   :  { %2514 = vrcp.f32 %v1978_v24 }
 0x4a5   :  { %v2513_v52 = vpop.eup %2512 }
 0x4a7   :  { %v2515_v10 = vpop.eup %2514 }
 0x4a8   :  { %v1985_v44 = vcombine.low %v2513_v52, %v2515_v10  ;;  %v1986_v35 = vcombine.high %v2513_v52, %v2515_v10 }
 0x4aa   :  { %v1993_v39 = vrot.slane %v1985_v44, %v1992_v3  ;;  %v2000_v29 = vrot.slane %v1986_v35, %v1992_v3  ;;  %v3835_v44 = vld [vmem:[#allocation34_spill] sm:$0xff] }
 0x4ac   :  { %v2001_v59 = vcombine.high %v1993_v39, %v1993_v39  ;;  %v2002_v46 = vcombine.high %v2000_v29, %v2000_v29  ;;  %v2009_v43 = vrot.slane %v1993_v39, %v1992_v3  ;;  %v2016_v57 = vrot.slane %v2000_v29, %v1992_v3  ;;  %v3836_v39 = vld [vmem:[#allocation35_spill] sm:$0xff] }
 0x4ae   :  { %v2023_v17 = vrot.slane %v2001_v59, %v1992_v3  ;;  %v2030_v11 = vrot.slane %v2002_v46, %v1992_v3  ;;  %v2031_v62 = vcombine.high %v2009_v43, %v2009_v43  ;;  %v2032_v25 = vcombine.high %v2016_v57, %v2016_v57  ;;  %v3834_v3 = vld [vmem:[#allocation23_spill] sm:$0xff]  ;;  %v3837_v59 = vld [vmem:[#allocation18_spill] sm:$0xff] }
 0x4af   :  { %v2038_v37 = vrot.slane %v2009_v43, %v3121_v23  ;;  %v2042_v19 = vrot.slane %v2009_v43, %v3128_v34  ;;  %v3576_v32 = vrot.slane %v2016_v57, %v3121_v23  ;;  %v3579_v5 = vrot.slane %v2016_v57, %v3128_v34  ;;  %v3838_v43 = vld [vmem:[#allocation19_spill] sm:$0xff] }
 0x4b0   :  { %v2033_v41 = vcombine.high %v2023_v17, %v2023_v17  ;;  %v2034_v31 = vcombine.high %v2030_v11, %v2030_v11  ;;  %v2046_v27 = vrot.slane %v2023_v17, %v3121_v23  ;;  %v2050_v50 = vrot.slane %v2023_v17, %v3128_v34  ;;  %v3839_v17 = vld [vmem:[#allocation20_spill] sm:$0xff] }
 0x4b1   :  { %v2054_v54 = vrot.slane %v2031_v62, %v3121_v23  ;;  %v2058_v4 = vrot.slane %v2031_v62, %v3128_v34  ;;  %v3586_v21 = vrot.slane %v2030_v11, %v3121_v23  ;;  %v3589_v30 = vrot.slane %v2030_v11, %v3128_v34  ;;  %v3840_v62 = vld [vmem:[#allocation21_spill] sm:$0xff] }
 0x4b2   :  { %v2062_v61 = vrot.slane %v2033_v41, %v3121_v23  ;;  %v2066_v7 = vrot.slane %v2033_v41, %v3128_v34  ;;  %v3594_v8 = vrot.slane %v2032_v25, %v3121_v23  ;;  %v3597_v49 = vrot.slane %v2032_v25, %v3128_v34  ;;  %v3842_v41 = vld [vmem:[#allocation25_spill] sm:$0xff] }
 0x4b3   :  { %v3600_v63 = vrot.slane %v2034_v31, %v3121_v23  ;;  %v3603_v51 = vrot.slane %v2034_v31, %v3128_v34  ;;  %v2115_v15 = vmul.f32 %v2038_v37, %v3148_v48  ;;  %v2116_v55 = vmul.f32 %v2042_v19, %v3150_v56  ;;  %v3830_v34 = vld [vmem:[#allocation17_spill] sm:$0xff]  ;;  %v3831_v48 = vld [vmem:[#allocation12_spill] sm:$0xff] }
 0x4b4   :  { %v2117_v28 = vmul.f32 %v2038_v37, %v3144_v47  ;;  %v2118_v12 = vmul.f32 %v2042_v19, %v3824_v6  ;;  %v2119_v1 = vmul.f32 %v2038_v37, %v3825_v33  ;;  %v2120_v60 = vmul.f32 %v2042_v19, %v3826_v45 }
 0x4b5   :  { %v2121_v38 = vmul.f32 %v2038_v37, %v3827_v22  ;;  %v2122_v23 = vmul.f32 %v2042_v19, %v3828_v16  ;;  %v2123_v24 = vmul.f32 %v2046_v27, %v3829_v58  ;;  %v2124_v36 = vmul.f32 %v2050_v50, %v3830_v34  ;;  %2179 = vst [vmem:[#allocation7] sm:$0xff] %v2115_v15  ;;  %v3841_v37 = vld [vmem:[#allocation24_spill] sm:$0xff]  ;;  %v3844_v15 = vld [vmem:[#allocation43_spill] sm:$0xff] }
 0x4b6   :  { %2180 = vst [vmem:[#allocation7 + $0x8] sm:$0xff] %v2116_v55  ;;  %v2125_v56 = vmul.f32 %v2046_v27, %v3831_v48  ;;  %v2126_v47 = vmul.f32 %v2050_v50, %v3832_v40  ;;  %v2127_v52 = vmul.f32 %v2046_v27, %v3833_v2  ;;  %v2128_v10 = vmul.f32 %v2050_v50, %v3834_v3 }
 0x4b7   :  { %2181 = vst [vmem:[#allocation7 + $0x10] sm:$0xff] %v2117_v28  ;;  %2182 = vst [vmem:[#allocation7 + $0x18] sm:$0xff] %v2118_v12  ;;  %v2129_v35 = vmul.f32 %v2046_v27, %v3835_v44  ;;  %v2130_v29 = vmul.f32 %v2050_v50, %v3836_v39  ;;  %v2131_v46 = vmul.f32 %v2054_v54, %v3837_v59  ;;  %v3843_v27 = vld [vmem:[#allocation42_spill] sm:$0xff]  ;;  %v3846_v12 = vld [vmem:[#allocation27_spill] sm:$0xff] }
 0x4b8   :  { %2183 = vst [vmem:[#allocation7 + $0x20] sm:$0xff] %v2119_v1  ;;  %2184 = vst [vmem:[#allocation7 + $0x28] sm:$0xff] %v2120_v60  ;;  %v2132_v57 = vmul.f32 %v2058_v4, %v3838_v43  ;;  %v2133_v11 = vmul.f32 %v2054_v54, %v3839_v17  ;;  %v2134_v25 = vmul.f32 %v2058_v4, %v3840_v62  ;;  %v3845_v28 = vld [vmem:[#allocation26_spill] sm:$0xff]  ;;  %v3847_v1 = vld [vmem:[#allocation28_spill] sm:$0xff] }
 0x4b9   :  { %2185 = vst [vmem:[#allocation7 + $0x30] sm:$0xff] %v2121_v38  ;;  %2186 = vst [vmem:[#allocation7 + $0x38] sm:$0xff] %v2122_v23  ;;  %v2135_v19 = vmul.f32 %v2054_v54, %v3841_v37  ;;  %v2136_v31 = vmul.f32 %v2058_v4, %v3842_v41  ;;  %v2137_v50 = vmul.f32 %v2054_v54, %v3843_v27  ;;  %v3848_v60 = vld [vmem:[#allocation29_spill] sm:$0xff]  ;;  %v3849_v38 = vld [vmem:[#allocation40_spill] sm:$0xff] }
 0x4ba   :  { %2187 = vst [vmem:[#allocation7 + $0x40] sm:$0xff] %v2123_v24  ;;  %2188 = vst [vmem:[#allocation7 + $0x48] sm:$0xff] %v2124_v36  ;;  %v2138_v55 = vmul.f32 %v2058_v4, %v3844_v15  ;;  %v2139_v6 = vmul.f32 %v2062_v61, %v3845_v28  ;;  %v2140_v33 = vmul.f32 %v2066_v7, %v3846_v12  ;;  %v3850_v23 = vld [vmem:[#allocation41_spill] sm:$0xff]  ;;  %v3851_v54 = vld [vmem:[#allocation48_spill] sm:$0xff] }
 0x4bb   :  { %2189 = vst [vmem:[#allocation7 + $0x50] sm:$0xff] %v2125_v56  ;;  %2190 = vst [vmem:[#allocation7 + $0x58] sm:$0xff] %v2126_v47  ;;  %v2141_v45 = vmul.f32 %v2062_v61, %v3847_v1  ;;  %v2142_v22 = vmul.f32 %v2066_v7, %v3848_v60  ;;  %v2143_v16 = vmul.f32 %v2062_v61, %v3849_v38  ;;  %v3852_v24 = vld [vmem:[#allocation49_spill] sm:$0xff]  ;;  %v3853_v36 = vld [vmem:[#allocation32_spill] sm:$0xff] }
 0x4bc   :  { %2191 = vst [vmem:[#allocation7 + $0x60] sm:$0xff] %v2127_v52  ;;  %2192 = vst [vmem:[#allocation7 + $0x68] sm:$0xff] %v2128_v10  ;;  %v2144_v58 = vmul.f32 %v2066_v7, %v3850_v23  ;;  %v2145_v4 = vmul.f32 %v2062_v61, %v3851_v54  ;;  %v2146_v34 = vmul.f32 %v2066_v7, %v3852_v24  ;;  %v3854_v56 = vld [vmem:[#allocation33_spill] sm:$0xff]  ;;  %v3855_v47 = vld [vmem:[#allocation30_spill] sm:$0xff] }
 0x4bd   :  { %2193 = vst [vmem:[#allocation7 + $0x70] sm:$0xff] %v2129_v35  ;;  %2194 = vst [vmem:[#allocation7 + $0x78] sm:$0xff] %v2130_v29  ;;  %v2147_v48 = vmul.f32 %v3576_v32, %v3853_v36  ;;  %v2148_v40 = vmul.f32 %v3579_v5, %v3854_v56  ;;  %v2149_v2 = vmul.f32 %v3576_v32, %v3855_v47  ;;  %v3856_v52 = vld [vmem:[#allocation31_spill] sm:$0xff]  ;;  %v3857_v10 = vld [vmem:[#allocation46_spill] sm:$0xff] }
 0x4be   :  { %2195 = vst [vmem:[#allocation7 + $0x80] sm:$0xff] %v2131_v46  ;;  %2196 = vst [vmem:[#allocation7 + $0x88] sm:$0xff] %v2132_v57  ;;  %v2150_v3 = vmul.f32 %v3579_v5, %v3856_v52  ;;  %v2151_v61 = vmul.f32 %v3576_v32, %v3857_v10  ;;  %v3858_v7 = vld [vmem:[#allocation47_spill] sm:$0xff]  ;;  %v3859_v35 = vld [vmem:[#allocation54_spill] sm:$0xff]  ;;  %v2164_v28 = vmul.f32 %v3597_v49, %v3350_v0 }
 0x4bf   :  { %2197 = vst [vmem:[#allocation7 + $0x90] sm:$0xff] %v2133_v11  ;;  %2198 = vst [vmem:[#allocation7 + $0x98] sm:$0xff] %v2134_v25  ;;  %v2152_v44 = vmul.f32 %v3579_v5, %v3858_v7  ;;  %v2153_v39 = vmul.f32 %v3576_v32, %v3859_v35  ;;  %v3860_v29 = vld [vmem:[#allocation55_spill] sm:$0xff]  ;;  %v3861_v46 = vld [vmem:[#allocation38_spill] sm:$0xff]  ;;  %v2166_v12 = vmul.f32 %v3597_v49, %v3398_v42 }
 0x4c0   :  { %2199 = vst [vmem:[#allocation7 + $0xa0] sm:$0xff] %v2135_v19  ;;  %2200 = vst [vmem:[#allocation7 + $0xa8] sm:$0xff] %v2136_v31  ;;  %v2154_v59 = vmul.f32 %v3579_v5, %v3860_v29  ;;  %v2155_v43 = vmul.f32 %v3586_v21, %v3861_v46  ;;  %v3862_v57 = vld [vmem:[#allocation39_spill] sm:$0xff]  ;;  %v3863_v11 = vld [vmem:[#allocation44_spill] sm:$0xff]  ;;  %v2178_v23 = vmul.f32 %v3603_v51, %v3526_v20 }
 0x4c1   :  { %2201 = vst [vmem:[#allocation7 + $0xb0] sm:$0xff] %v2137_v50  ;;  %2202 = vst [vmem:[#allocation7 + $0xb8] sm:$0xff] %v2138_v55  ;;  %v2156_v17 = vmul.f32 %v3589_v30, %v3862_v57  ;;  %v2157_v62 = vmul.f32 %v3586_v21, %v3863_v11  ;;  %v3864_v25 = vld [vmem:[#allocation45_spill] sm:$0xff]  ;;  %v3865_v32 = vld [vmem:[#allocation52_spill] sm:$0xff]  ;;  %v2163_v55 = vmul.f32 %v3594_v8, %v3348_v14 }
 0x4c2   :  { %2203 = vst [vmem:[#allocation7 + $0xc0] sm:$0xff] %v2139_v6  ;;  %2204 = vst [vmem:[#allocation7 + $0xc8] sm:$0xff] %v2140_v33  ;;  %v2158_v37 = vmul.f32 %v3589_v30, %v3864_v25  ;;  %v2159_v19 = vmul.f32 %v3586_v21, %v3865_v32  ;;  %v3866_v5 = vld [vmem:[#allocation53_spill] sm:$0xff]  ;;  %v3867_v31 = vld [vmem:[#allocation58_spill] sm:$0xff]  ;;  %v2165_v6 = vmul.f32 %v3594_v8, %v3386_v53 }
 0x4c3   :  { %2205 = vst [vmem:[#allocation7 + $0xd0] sm:$0xff] %v2141_v45  ;;  %2206 = vst [vmem:[#allocation7 + $0xd8] sm:$0xff] %v2142_v22  ;;  %v2160_v41 = vmul.f32 %v3589_v30, %v3866_v5  ;;  %v2161_v27 = vmul.f32 %v3586_v21, %v3867_v31  ;;  %v3868_v50 = vld [vmem:[#allocation59_spill] sm:$0xff]  ;;  %v2167_v21 = vmul.f32 %v3594_v8, %v3466_v26  ;;  %v3869_v0 = vld [vmem:[#allocation60_spill] sm:$0xff] }
 0x4c4   :  { %2207 = vst [vmem:[#allocation7 + $0xe0] sm:$0xff] %v2143_v16  ;;  %2208 = vst [vmem:[#allocation7 + $0xe8] sm:$0xff] %v2144_v58  ;;  %v2162_v15 = vmul.f32 %v3589_v30, %v3868_v50  ;;  %v2168_v30 = vmul.f32 %v3597_v49, %v3468_v18  ;;  %v2169_v14 = vmul.f32 %v3594_v8, %v3494_v9  ;;  %v3870_v33 = vld [vmem:[#allocation50_spill] sm:$0xff]  ;;  %v3871_v1 = vld [vmem:[#allocation51_spill] sm:$0xff] }
 0x4c5   :  { %2209 = vst [vmem:[#allocation7 + $0xf0] sm:$0xff] %v2145_v4  ;;  %2210 = vst [vmem:[#allocation7 + $0xf8] sm:$0xff] %v2146_v34  ;;  %v2170_v53 = vmul.f32 %v3597_v49, %v3869_v0  ;;  %v2171_v42 = vmul.f32 %v3600_v63, %v3870_v33  ;;  %v2172_v26 = vmul.f32 %v3603_v51, %v3871_v1  ;;  %v3872_v18 = vld [vmem:[#allocation56_spill] sm:$0xff]  ;;  %v3873_v60 = vld [vmem:[#allocation57_spill] sm:$0xff] }
 0x4c6   :  { %2211 = vst [vmem:[#allocation7 + $0x100] sm:$0xff] %v2147_v48  ;;  %2212 = vst [vmem:[#allocation7 + $0x108] sm:$0xff] %v2148_v40  ;;  %v2173_v45 = vmul.f32 %v3600_v63, %v3872_v18  ;;  %v2174_v22 = vmul.f32 %v3603_v51, %v3873_v60  ;;  %v3874_v9 = vld [vmem:[#allocation61_spill] sm:$0xff]  ;;  %v3875_v49 = vld [vmem:[#allocation62_spill] sm:$0xff]  ;;  %v2177_v16 = vmul.f32 %v3600_v63, %v3524_v13 }
 0x4c7   :  { %2213 = vst [vmem:[#allocation7 + $0x110] sm:$0xff] %v2149_v2  ;;  %2214 = vst [vmem:[#allocation7 + $0x118] sm:$0xff] %v2150_v3  ;;  %v2175_v8 = vmul.f32 %v3600_v63, %v3874_v9  ;;  %v2176_v38 = vmul.f32 %v3603_v51, %v3875_v49 }
 0x4c8   :  { %2215 = vst [vmem:[#allocation7 + $0x120] sm:$0xff] %v2151_v61  ;;  %2216 = vst [vmem:[#allocation7 + $0x128] sm:$0xff] %v2152_v44 }
 0x4c9   :  { %2217 = vst [vmem:[#allocation7 + $0x130] sm:$0xff] %v2153_v39  ;;  %2218 = vst [vmem:[#allocation7 + $0x138] sm:$0xff] %v2154_v59 }
 0x4ca   :  { %2219 = vst [vmem:[#allocation7 + $0x140] sm:$0xff] %v2155_v43  ;;  %2220 = vst [vmem:[#allocation7 + $0x148] sm:$0xff] %v2156_v17 }
 0x4cb   :  { %2221 = vst [vmem:[#allocation7 + $0x150] sm:$0xff] %v2157_v62  ;;  %2222 = vst [vmem:[#allocation7 + $0x158] sm:$0xff] %v2158_v37 }
 0x4cc   :  { %2223 = vst [vmem:[#allocation7 + $0x160] sm:$0xff] %v2159_v19  ;;  %2224 = vst [vmem:[#allocation7 + $0x168] sm:$0xff] %v2160_v41 }
 0x4cd   :  { %2225 = vst [vmem:[#allocation7 + $0x170] sm:$0xff] %v2161_v27  ;;  %2226 = vst [vmem:[#allocation7 + $0x178] sm:$0xff] %v2162_v15 }
 0x4ce   :  { %2227 = vst [vmem:[#allocation7 + $0x180] sm:$0xff] %v2163_v55  ;;  %2228 = vst [vmem:[#allocation7 + $0x188] sm:$0xff] %v2164_v28 }
 0x4cf   :  { %2229 = vst [vmem:[#allocation7 + $0x190] sm:$0xff] %v2165_v6  ;;  %2230 = vst [vmem:[#allocation7 + $0x198] sm:$0xff] %v2166_v12 }
 0x4d0   :  { %2231 = vst [vmem:[#allocation7 + $0x1a0] sm:$0xff] %v2167_v21  ;;  %2232 = vst [vmem:[#allocation7 + $0x1a8] sm:$0xff] %v2168_v30 }
 0x4d1   :  { %2233 = vst [vmem:[#allocation7 + $0x1b0] sm:$0xff] %v2169_v14  ;;  %2234 = vst [vmem:[#allocation7 + $0x1b8] sm:$0xff] %v2170_v53 }
 0x4d2   :  { %2235 = vst [vmem:[#allocation7 + $0x1c0] sm:$0xff] %v2171_v42  ;;  %2236 = vst [vmem:[#allocation7 + $0x1c8] sm:$0xff] %v2172_v26 }
 0x4d3   :  { %2237 = vst [vmem:[#allocation7 + $0x1d0] sm:$0xff] %v2173_v45  ;;  %2238 = vst [vmem:[#allocation7 + $0x1d8] sm:$0xff] %v2174_v22 }
 0x4d4   :  { %2239 = vst [vmem:[#allocation7 + $0x1e0] sm:$0xff] %v2175_v8  ;;  %2240 = vst [vmem:[#allocation7 + $0x1e8] sm:$0xff] %v2176_v38 }
 0x4d5   :  { %2241 = vst [vmem:[#allocation7 + $0x1f0] sm:$0xff] %v2177_v16  ;;  %2242 = vst [vmem:[#allocation7 + $0x1f8] sm:$0xff] %v2178_v23 }
 0x4d6   :  { %2631 = shalt.err (!%p2628_p0)
}
 0x4d7   :  { %2254 = dma.vmem_to_hbm [thread:$0]  %s2249_s13, 8192, %s3711_s4, [#allocation4], %s2647_s18, %s2647_s18, %s2648_s19  }
 0x4d8   :  { %2644 = dma.done.wait [#allocation4], 8192  }
 0x4d9   :  { %2645 = vsyncadd [#allocation4], 4294959104 }
 0x4da   :  { %2258 = vsyncpa [#allocation3], 1 }
 0x4db   :  { %2259 = vsyncpa [#allocation6], 1 }
 0x4dc   :  { %2260 = vsyncpa [#allocation4], 1 }

</bundles_post_ra>
